<compile_context>
chip_gen: v7x
topology: tpu7x:2x2x1
jax: 0.10.0
libtpu: 0.0.40
codegen_flags: <defaults>
</compile_context>

<pallas_src>
import functools
import math

import jax
import jax.numpy as jnp
from jax.experimental import pallas as pl
from jax.experimental.pallas import tpu as pltpu

LN_EPS = 1e-5
NEG_INF = -1e9


# ------------------------------ in-kernel helpers --------------------------- #

def _ln(x, g, b):
    mu = jnp.mean(x, axis=-1, keepdims=True)
    var = jnp.mean(jnp.square(x - mu), axis=-1, keepdims=True)
    return (x - mu) * jax.lax.rsqrt(var + LN_EPS) * g + b


def _gelu_new(y):
    # GPT-2 "gelu_new" (tanh approximation).
    c = jnp.float32(0.7978845608028654)  # sqrt(2/pi)
    return 0.5 * y * (1.0 + jnp.tanh(c * (y + 0.044715 * y * y * y)))


# --------------------- fused full-stack transformer kernel ------------------ #
# grid = (B//Bblk, L); batch-block axis is "parallel", layer axis "arbitrary".
# Hidden state [Bblk*S, D] and the causal+pad bias [Bblk, S, S] live in VMEM
# scratch across the layer axis.  The only HBM output is the [B, 1] probability.

def _gpt2_stack_kernel(pad_ref, h0_ref,
                       ln1_g, ln1_b, wqkv, bqkv, wproj, bproj,
                       ln2_g, ln2_b, wfc, bfc, wmp, bmp,
                       lnf_g, lnf_b, head_w, head_b,
                       prob_ref,
                       h_scr, bias_scr,
                       *, n_head, d_head, bblk, seq):
    l = pl.program_id(1)
    S, H, Dh = seq, n_head, d_head
    D = H * Dh
    scale = jnp.float32(1.0 / math.sqrt(Dh))

    @pl.when(l == 0)
    def _init():
        h_scr[...] = h0_ref[...]                               # [Bblk*S, D]
        # cached causal + padding bias, built once and reused by all layers/heads
        rows = jax.lax.broadcasted_iota(jnp.int32, (S, S), 0)
        cols = jax.lax.broadcasted_iota(jnp.int32, (S, S), 1)
        causal = jnp.where(cols <= rows, 0.0, NEG_INF).astype(jnp.float32)
        for b in range(bblk):                                  # tiny static loop
            bias_scr[b] = causal + pad_ref[pl.ds(b, 1), :]     # [S,S] + [1,S]

    h = h_scr[...]                                             # [M, D] f32, M = Bblk*S

    # ---------------- attention sub-block (pre-LN), fused QKV --------------- #
    x = _ln(h, ln1_g[...], ln1_b[...]).astype(jnp.bfloat16)    # [M, D] bf16
    qkv = jnp.dot(x, wqkv[...],
                  preferred_element_type=jnp.float32) + bqkv[...]   # [M, 3D]
    q_all = qkv[:, 0:D]
    k_all = qkv[:, D:2 * D]
    v_all = qkv[:, 2 * D:3 * D]

    # per-(batch-in-block, head) scores/softmax; contexts concatenated in vregs.
    # (At real H/S this becomes a fori_loop / flash-tiled loop.)
    ctx_rows = []
    for b in range(bblk):
        bias_b = bias_scr[b]                                   # [S, S] cached
        q_b = q_all[b * S:(b + 1) * S, :]
        k_b = k_all[b * S:(b + 1) * S, :]
        v_b = v_all[b * S:(b + 1) * S, :]
        head_outs = []
        for hd in range(H):
            q = q_b[:, hd * Dh:(hd + 1) * Dh].astype(jnp.bfloat16)
            k = k_b[:, hd * Dh:(hd + 1) * Dh].astype(jnp.bfloat16)
            v = v_b[:, hd * Dh:(hd + 1) * Dh].astype(jnp.bfloat16)
            s = jax.lax.dot_general(q, k, (((1,), (1,)), ((), ())),
                                    preferred_element_type=jnp.float32)
            s = s * scale + bias_b                             # [S, S]
            m = jnp.max(s, axis=-1, keepdims=True)
            p = jnp.exp(s - m)
            p = p * pl.reciprocal(jnp.sum(p, axis=-1, keepdims=True), approx=True)
            head_outs.append(jnp.dot(p.astype(jnp.bfloat16), v,
                                     preferred_element_type=jnp.float32))
        ctx_rows.append(jnp.concatenate(head_outs, axis=-1))   # [S, D]
    ctx = jnp.concatenate(ctx_rows, axis=0).astype(jnp.bfloat16)      # [M, D]

    # single lane-dense output projection (replaces H per-head matmul adds)
    h = h + jnp.dot(ctx, wproj[...],
                    preferred_element_type=jnp.float32) + bproj[...]

    # ---------------- MLP sub-block (pre-LN) -------------------------------- #
    x2 = _ln(h, ln2_g[...], ln2_b[...]).astype(jnp.bfloat16)
    m1 = jnp.dot(x2, wfc[...], preferred_element_type=jnp.float32) + bfc[...]
    m1 = _gelu_new(m1).astype(jnp.bfloat16)
    h = h + jnp.dot(m1, wmp[...], preferred_element_type=jnp.float32) + bmp[...]

    h_scr[...] = h

    # -------- fused epilogue: final LN + mean-pool + Linear(D,1) + sigmoid -- #
    @pl.when(l == pl.num_programs(1) - 1)
    def _epilogue():
        hf = _ln(h, lnf_g[...], lnf_b[...])                    # [M, D]
        pooled = jnp.concatenate(
            [jnp.mean(hf[b * S:(b + 1) * S, :], axis=0, keepdims=True)
             for b in range(bblk)], axis=0)                    # [Bblk, D]
        logit = jnp.sum(pooled * head_w[...], axis=-1,
                        keepdims=True) + head_b[...]           # [Bblk, 1]
        prob_ref[...] = 1.0 / (1.0 + jnp.exp(-logit))          # sigmoid


# ------------------------------ model (glue) -------------------------------- #

def init_params(key, vocab, n_pos, d_model, n_head, n_layer):
    keys = jax.random.split(key, 8)

    def normal(k, shape, std=0.02):
        return (std * jax.random.normal(k, shape)).astype(jnp.float32)

    D, L = d_model, n_layer

    params = dict(
        n_head=n_head,
        wte=normal(keys[0], (vocab, D)),
        wpe=normal(keys[1], (n_pos, D)),
        lnf_g=jnp.ones((1, D), jnp.float32),
        lnf_b=jnp.zeros((1, D), jnp.float32),
        head_w=normal(keys[2], (1, D)),                    # self.rogistic (out,in)
        head_b=jnp.zeros((1, 1), jnp.float32),
        # layer-stacked parameters (leading L axis, selected by the grid index_map);
        # weights pre-cast ONCE to bf16, kept in their natural lane-dense layout.
        ln1_g=jnp.ones((L, 1, D), jnp.float32),
        ln1_b=jnp.zeros((L, 1, D), jnp.float32),
        ln2_g=jnp.ones((L, 1, D), jnp.float32),
        ln2_b=jnp.zeros((L, 1, D), jnp.float32),
        wqkv=normal(keys[3], (L, D, 3 * D)).astype(jnp.bfloat16),
        bqkv=jnp.zeros((L, 1, 3 * D), jnp.float32),
        wproj=normal(keys[4], (L, D, D)).astype(jnp.bfloat16),
        bproj=jnp.zeros((L, 1, D), jnp.float32),
        wfc=normal(keys[5], (L, D, 4 * D)).astype(jnp.bfloat16),
        bfc=jnp.zeros((L, 1, 4 * D), jnp.float32),
        wmp=normal(keys[6], (L, 4 * D, D)).astype(jnp.bfloat16),
        bmp=jnp.zeros((L, 1, D), jnp.float32),
    )
    return params


def my_longformer_forward(params, input_ids, attention_mask,
                          global_attention_mask=None, labels=None, *, bblk=None):
    # global_attention_mask is accepted but unused — the reference module never
    # forwards it to the GPT-2 backbone either.
    del global_attention_mask
    B, S = input_ids.shape
    D = params["wte"].shape[1]
    H = params["n_head"]
    Dh = D // H
    L = params["ln1_g"].shape[0]
    if bblk is None:
        bblk = B            # toy size: whole batch in one M tile (M = B*S)
    assert B % bblk == 0

    # token + position embeddings (gather is glue), flattened to the matmul M layout
    h0 = (params["wte"][input_ids]
          + params["wpe"][jnp.arange(S)][None, :, :]).reshape(B * S, D)
    h0 = h0.astype(jnp.float32)
    # tiny [B, S] padding bias row; causal part is built inside the kernel once
    pad_bias = (1.0 - attention_mask.astype(jnp.float32)) * NEG_INF

    layer_keys = ("ln1_g", "ln1_b", "wqkv", "bqkv", "wproj", "bproj",
                  "ln2_g", "ln2_b", "wfc", "bfc", "wmp", "bmp")
    layer_params = [params[k] for k in layer_keys]
    head_params = [params["lnf_g"], params["lnf_b"],
                   params["head_w"], params["head_b"]]

    def lspec(arr):
        nd = arr.ndim
        return pl.BlockSpec((None,) + tuple(arr.shape[1:]),
                            lambda b, l, _nd=nd: (l,) + (0,) * (_nd - 1))

    def fullspec(arr):
        nd = arr.ndim
        return pl.BlockSpec(tuple(arr.shape),
                            lambda b, l, _nd=nd: (0,) * _nd)

    kernel = functools.partial(_gpt2_stack_kernel, n_head=H, d_head=Dh,
                               bblk=bblk, seq=S)
    prob = pl.pallas_call(
        kernel,
        out_shape=jax.ShapeDtypeStruct((B, 1), jnp.float32),
        grid=(B // bblk, L),
        in_specs=[pl.BlockSpec((bblk, S), lambda b, l: (b, 0)),          # pad bias
                  pl.BlockSpec((bblk * S, D), lambda b, l: (b, 0))]      # embeddings
                 + [lspec(p) for p in layer_params]
                 + [fullspec(p) for p in head_params],
        out_specs=pl.BlockSpec((bblk, 1), lambda b, l: (b, 0)),
        scratch_shapes=[pltpu.VMEM((bblk * S, D), jnp.float32),          # resident h
                        pltpu.VMEM((bblk, S, S), jnp.float32)],          # cached bias
        compiler_params=pltpu.CompilerParams(
            dimension_semantics=("parallel", "arbitrary"),
            # explicit VMEM budget; at real GPT-2 sizes tune per generation and
            # tile the MLP 4D axis instead of holding both MLP matrices resident.
            vmem_limit_bytes=32 * 1024 * 1024),
    )(pad_bias, h0, *layer_params, *head_params)                         # [B, 1]

    loss = 0
    if labels is not None:
        # BCE in plain JAX (per perf review: not worth a separate kernel launch).
        y = labels.astype(jnp.float32)
        logp = jnp.maximum(jnp.log(prob), -100.0)       # torch BCELoss log clamp
        log1mp = jnp.maximum(jnp.log(1.0 - prob), -100.0)
        loss = jnp.mean(-(y * logp + (1.0 - y) * log1mp))
    return prob, loss


# --------------------------------- main -------------------------------------- #

if __name__ == "__main__":
    B, S = 2, 8
    VOCAB, N_POS, D_MODEL, N_HEAD, N_LAYER = 64, 32, 32, 4, 2

    key = jax.random.PRNGKey(0)
    pkey, ikey, lkey = jax.random.split(key, 3)

    params = init_params(pkey, VOCAB, N_POS, D_MODEL, N_HEAD, N_LAYER)

    input_ids = jax.random.randint(ikey, (B, S), 0, VOCAB, dtype=jnp.int32)
    attention_mask = jnp.array([[1, 1, 1, 1, 1, 1, 1, 1],
                                [1, 1, 1, 1, 1, 1, 0, 0]], dtype=jnp.int32)
    global_attention_mask = jnp.zeros((B, S), jnp.int32)   # unused by reference fwd
    labels = jax.random.bernoulli(lkey, 0.5, (B, 1)).astype(jnp.float32)

    prob, loss = my_longformer_forward(params, input_ids, attention_mask,
                                       global_attention_mask, labels)
    jax.block_until_ready((prob, loss))

    assert prob.shape == (B, 1)
    assert bool(jnp.all(jnp.isfinite(prob))) and bool(jnp.isfinite(loss))
    assert bool(jnp.all((prob >= 0.0) & (prob <= 1.0)))
    print("KERNEL_OK")
</pallas_src>

<mosaic_0001>
module attributes {stable_mosaic.version = 11 : i64} {
  func.func @_gpt2_stack_kernel(%arg0: i32, %arg1: i32, %arg2: memref<2x8xf32, #tpu.memory_space<vmem>>, %arg3: memref<16x32xf32, #tpu.memory_space<vmem>>, %arg4: memref<1x1x32xf32, #tpu.memory_space<vmem>>, %arg5: memref<1x1x32xf32, #tpu.memory_space<vmem>>, %arg6: memref<1x32x96xbf16, #tpu.memory_space<vmem>>, %arg7: memref<1x1x96xf32, #tpu.memory_space<vmem>>, %arg8: memref<1x32x32xbf16, #tpu.memory_space<vmem>>, %arg9: memref<1x1x32xf32, #tpu.memory_space<vmem>>, %arg10: memref<1x1x32xf32, #tpu.memory_space<vmem>>, %arg11: memref<1x1x32xf32, #tpu.memory_space<vmem>>, %arg12: memref<1x32x128xbf16, #tpu.memory_space<vmem>>, %arg13: memref<1x1x128xf32, #tpu.memory_space<vmem>>, %arg14: memref<1x128x32xbf16, #tpu.memory_space<vmem>>, %arg15: memref<1x1x32xf32, #tpu.memory_space<vmem>>, %arg16: memref<1x32xf32, #tpu.memory_space<vmem>>, %arg17: memref<1x32xf32, #tpu.memory_space<vmem>>, %arg18: memref<1x32xf32, #tpu.memory_space<vmem>>, %arg19: memref<1x1xf32, #tpu.memory_space<vmem>>, %arg20: memref<2x1xf32, #tpu.memory_space<vmem>>, %arg21: memref<16x32xf32, #tpu.memory_space<vmem>>, %arg22: memref<2x8x8xf32, #tpu.memory_space<vmem>>) attributes {dimension_semantics = [#tpu.dimension_semantics<parallel>, #tpu.dimension_semantics<arbitrary>], iteration_bounds = array<i64: 1, 2>, scalar_prefetch = 0 : i64, scratch_operands = 2 : i64, tpu.core_type = #tpu.core_type<tc>, window_params = [{transform_indices = @transform_0, window_bounds = array<i64: 2, 8>}, {transform_indices = @transform_1, window_bounds = array<i64: 16, 32>}, {transform_indices = @transform_2, window_bounds = array<i64: 1, 1, 32>}, {transform_indices = @transform_3, window_bounds = array<i64: 1, 1, 32>}, {transform_indices = @transform_4, window_bounds = array<i64: 1, 32, 96>}, {transform_indices = @transform_5, window_bounds = array<i64: 1, 1, 96>}, {transform_indices = @transform_6, window_bounds = array<i64: 1, 32, 32>}, {transform_indices = @transform_7, window_bounds = array<i64: 1, 1, 32>}, {transform_indices = @transform_8, window_bounds = array<i64: 1, 1, 32>}, {transform_indices = @transform_9, window_bounds = array<i64: 1, 1, 32>}, {transform_indices = @transform_10, window_bounds = array<i64: 1, 32, 128>}, {transform_indices = @transform_11, window_bounds = array<i64: 1, 1, 128>}, {transform_indices = @transform_12, window_bounds = array<i64: 1, 128, 32>}, {transform_indices = @transform_13, window_bounds = array<i64: 1, 1, 32>}, {pipeline_mode = #tpu.pipeline_mode<synchronous>, transform_indices = @transform_14, window_bounds = array<i64: 1, 32>}, {pipeline_mode = #tpu.pipeline_mode<synchronous>, transform_indices = @transform_15, window_bounds = array<i64: 1, 32>}, {pipeline_mode = #tpu.pipeline_mode<synchronous>, transform_indices = @transform_16, window_bounds = array<i64: 1, 32>}, {pipeline_mode = #tpu.pipeline_mode<synchronous>, transform_indices = @transform_17, window_bounds = array<i64: 1, 1>}, {transform_indices = @transform_18, window_bounds = array<i64: 2, 1>}]} {
    %c0_i32 = arith.constant 0 : i32
    %0 = arith.cmpi eq, %arg1, %c0_i32 : i32
    %1 = arith.extui %0 : i1 to i32
    %c0_i32_0 = arith.constant 0 : i32
    %2 = arith.cmpi ne, %1, %c0_i32_0 : i32
    scf.if %2 {
      %c0_103 = arith.constant 0 : index
      %c0_104 = arith.constant 0 : index
      %299 = vector.load %arg3[%c0_103, %c0_104] : memref<16x32xf32, #tpu.memory_space<vmem>>, vector<16x32xf32>
      %c0_105 = arith.constant 0 : index
      %c0_106 = arith.constant 0 : index
      %300 = vector.load %arg21[%c0_105, %c0_106] : memref<16x32xf32, #tpu.memory_space<vmem>>, vector<16x32xf32>
      tpu.vector_store %arg21[%c0_105, %c0_106], %299 {strides = array<i32>} : memref<16x32xf32, #tpu.memory_space<vmem>>, vector<16x32xf32>,
      %301 = tpu.iota {dimensions = array<i32: 0>} : vector<8x8xi32>
      %302 = tpu.iota {dimensions = array<i32: 1>} : vector<8x8xi32>
      %303 = arith.cmpi sle, %302, %301 : vector<8x8xi32>
      %cst_107 = arith.constant 0.000000e+00 : f32
      %cst_108 = arith.constant -1.000000e+09 : f32
      %304 = vector.broadcast %cst_107 : f32 to vector<8x8xf32>
      %305 = vector.broadcast %cst_108 : f32 to vector<8x8xf32>
      %306 = arith.select %303, %304, %305 : vector<8x8xi1>, vector<8x8xf32>
      %c0_109 = arith.constant 0 : index
      %c0_110 = arith.constant 0 : index
      %307 = vector.load %arg2[%c0_109, %c0_110] : memref<2x8xf32, #tpu.memory_space<vmem>>, vector<1x8xf32>
      %308 = vector.broadcast %307 : vector<1x8xf32> to vector<8x8xf32>
      %309 = arith.addf %306, %308 : vector<8x8xf32>
      %c0_111 = arith.constant 0 : index
      %c0_112 = arith.constant 0 : index
      %c0_113 = arith.constant 0 : index
      %310 = vector.load %arg22[%c0_111, %c0_112, %c0_113] : memref<2x8x8xf32, #tpu.memory_space<vmem>>, vector<1x8x8xf32>
      %311 = vector.shape_cast %310 : vector<1x8x8xf32> to vector<8x8xf32>
      %312 = vector.shape_cast %309 : vector<8x8xf32> to vector<1x8x8xf32>
      tpu.vector_store %arg22[%c0_111, %c0_112, %c0_113], %312 {strides = array<i32>} : memref<2x8x8xf32, #tpu.memory_space<vmem>>, vector<1x8x8xf32>,
      %c1_114 = arith.constant 1 : index
      %c0_115 = arith.constant 0 : index
      %313 = vector.load %arg2[%c1_114, %c0_115] : memref<2x8xf32, #tpu.memory_space<vmem>>, vector<1x8xf32>
      %314 = vector.broadcast %313 : vector<1x8xf32> to vector<8x8xf32>
      %315 = arith.addf %306, %314 : vector<8x8xf32>
      %c1_116 = arith.constant 1 : index
      %c0_117 = arith.constant 0 : index
      %c0_118 = arith.constant 0 : index
      %316 = vector.load %arg22[%c1_116, %c0_117, %c0_118] : memref<2x8x8xf32, #tpu.memory_space<vmem>>, vector<1x8x8xf32>
      %317 = vector.shape_cast %316 : vector<1x8x8xf32> to vector<8x8xf32>
      %318 = vector.shape_cast %315 : vector<8x8xf32> to vector<1x8x8xf32>
      tpu.vector_store %arg22[%c1_116, %c0_117, %c0_118], %318 {strides = array<i32>} : memref<2x8x8xf32, #tpu.memory_space<vmem>>, vector<1x8x8xf32>,
    } else {
    }
    %c0 = arith.constant 0 : index
    %c0_1 = arith.constant 0 : index
    %3 = vector.load %arg21[%c0, %c0_1] : memref<16x32xf32, #tpu.memory_space<vmem>>, vector<16x32xf32>
    %c0_2 = arith.constant 0 : index
    %c0_3 = arith.constant 0 : index
    %c0_4 = arith.constant 0 : index
    %4 = vector.load %arg4[%c0_2, %c0_3, %c0_4] : memref<1x1x32xf32, #tpu.memory_space<vmem>>, vector<1x1x32xf32>
    %5 = vector.shape_cast %4 : vector<1x1x32xf32> to vector<1x32xf32>
    %c0_5 = arith.constant 0 : index
    %c0_6 = arith.constant 0 : index
    %c0_7 = arith.constant 0 : index
    %6 = vector.load %arg5[%c0_5, %c0_6, %c0_7] : memref<1x1x32xf32, #tpu.memory_space<vmem>>, vector<1x1x32xf32>
    %7 = vector.shape_cast %6 : vector<1x1x32xf32> to vector<1x32xf32>
    %cst = arith.constant dense<0.000000e+00> : vector<16xf32>
    %8 = vector.multi_reduction <add>, %3, %cst [1] : vector<16x32xf32> to vector<16xf32>
    %9 = vector.shape_cast %8 : vector<16xf32> to vector<16x1xf32>
    %cst_8 = arith.constant 3.200000e+01 : f32
    %10 = vector.broadcast %cst_8 : f32 to vector<16x1xf32>
    %11 = arith.divf %9, %10 : vector<16x1xf32>
    %12 = vector.broadcast %11 : vector<16x1xf32> to vector<16x32xf32>
    %13 = arith.subf %3, %12 : vector<16x32xf32>
    %14 = arith.mulf %13, %13 : vector<16x32xf32>
    %cst_9 = arith.constant dense<0.000000e+00> : vector<16xf32>
    %15 = vector.multi_reduction <add>, %14, %cst_9 [1] : vector<16x32xf32> to vector<16xf32>
    %16 = vector.shape_cast %15 : vector<16xf32> to vector<16x1xf32>
    %cst_10 = arith.constant 3.200000e+01 : f32
    %17 = vector.broadcast %cst_10 : f32 to vector<16x1xf32>
    %18 = arith.divf %16, %17 : vector<16x1xf32>
    %19 = vector.broadcast %11 : vector<16x1xf32> to vector<16x32xf32>
    %20 = arith.subf %3, %19 : vector<16x32xf32>
    %cst_11 = arith.constant 9.99999974E-6 : f32
    %21 = vector.broadcast %cst_11 : f32 to vector<16x1xf32>
    %22 = arith.addf %18, %21 : vector<16x1xf32>
    %23 = math.rsqrt %22 : vector<16x1xf32>
    %24 = vector.broadcast %23 : vector<16x1xf32> to vector<16x32xf32>
    %25 = arith.mulf %20, %24 : vector<16x32xf32>
    %26 = vector.broadcast %5 : vector<1x32xf32> to vector<16x32xf32>
    %27 = arith.mulf %25, %26 : vector<16x32xf32>
    %28 = vector.broadcast %7 : vector<1x32xf32> to vector<16x32xf32>
    %29 = arith.addf %27, %28 : vector<16x32xf32>
    %30 = arith.truncf %29 : vector<16x32xf32> to vector<16x32xbf16>
    %c0_12 = arith.constant 0 : index
    %c0_13 = arith.constant 0 : index
    %c0_14 = arith.constant 0 : index
    %31 = vector.load %arg6[%c0_12, %c0_13, %c0_14] : memref<1x32x96xbf16, #tpu.memory_space<vmem>>, vector<1x32x96xbf16>
    %32 = vector.shape_cast %31 : vector<1x32x96xbf16> to vector<32x96xbf16>
    %cst_15 = arith.constant dense<0.000000e+00> : vector<16x96xf32>
    %33 = tpu.matmul %30, %32, %cst_15 {dimension_numbers = #tpu.dot_dimension_numbers<[1], [0], [0], [1], [0, 0, 1, 1], [], []>} : vector<16x32xbf16>, vector<32x96xbf16>, vector<16x96xf32> -> vector<16x96xf32>
    %c0_16 = arith.constant 0 : index
    %c0_17 = arith.constant 0 : index
    %c0_18 = arith.constant 0 : index
    %34 = vector.load %arg7[%c0_16, %c0_17, %c0_18] : memref<1x1x96xf32, #tpu.memory_space<vmem>>, vector<1x1x96xf32>
    %35 = vector.shape_cast %34 : vector<1x1x96xf32> to vector<1x96xf32>
    %36 = vector.broadcast %35 : vector<1x96xf32> to vector<16x96xf32>
    %37 = arith.addf %33, %36 : vector<16x96xf32>
    %38 = vector.extract_strided_slice %37 {offsets = [0, 0], sizes = [16, 32], strides = [1, 1]} : vector<16x96xf32> to vector<16x32xf32>
    %39 = vector.extract_strided_slice %37 {offsets = [0, 32], sizes = [16, 32], strides = [1, 1]} : vector<16x96xf32> to vector<16x32xf32>
    %40 = vector.extract_strided_slice %37 {offsets = [0, 64], sizes = [16, 32], strides = [1, 1]} : vector<16x96xf32> to vector<16x32xf32>
    %c0_19 = arith.constant 0 : index
    %c0_20 = arith.constant 0 : index
    %c0_21 = arith.constant 0 : index
    %41 = vector.load %arg22[%c0_19, %c0_20, %c0_21] : memref<2x8x8xf32, #tpu.memory_space<vmem>>, vector<1x8x8xf32>
    %42 = vector.shape_cast %41 : vector<1x8x8xf32> to vector<8x8xf32>
    %43 = vector.extract_strided_slice %38 {offsets = [0, 0], sizes = [8, 32], strides = [1, 1]} : vector<16x32xf32> to vector<8x32xf32>
    %44 = vector.extract_strided_slice %39 {offsets = [0, 0], sizes = [8, 32], strides = [1, 1]} : vector<16x32xf32> to vector<8x32xf32>
    %45 = vector.extract_strided_slice %40 {offsets = [0, 0], sizes = [8, 32], strides = [1, 1]} : vector<16x32xf32> to vector<8x32xf32>
    %46 = vector.extract_strided_slice %43 {offsets = [0, 0], sizes = [8, 8], strides = [1, 1]} : vector<8x32xf32> to vector<8x8xf32>
    %47 = arith.truncf %46 : vector<8x8xf32> to vector<8x8xbf16>
    %48 = vector.extract_strided_slice %44 {offsets = [0, 0], sizes = [8, 8], strides = [1, 1]} : vector<8x32xf32> to vector<8x8xf32>
    %49 = arith.truncf %48 : vector<8x8xf32> to vector<8x8xbf16>
    %50 = vector.extract_strided_slice %45 {offsets = [0, 0], sizes = [8, 8], strides = [1, 1]} : vector<8x32xf32> to vector<8x8xf32>
    %51 = arith.truncf %50 : vector<8x8xf32> to vector<8x8xbf16>
    %cst_22 = arith.constant dense<0.000000e+00> : vector<8x8xf32>
    %52 = tpu.matmul %47, %49, %cst_22 {dimension_numbers = #tpu.dot_dimension_numbers<[1], [1], [0], [0], [0, 0, 1, 0], [], []>} : vector<8x8xbf16>, vector<8x8xbf16>, vector<8x8xf32> -> vector<8x8xf32>
    %cst_23 = arith.constant 0.353553385 : f32
    %53 = vector.broadcast %cst_23 : f32 to vector<8x8xf32>
    %54 = arith.mulf %52, %53 : vector<8x8xf32>
    %55 = arith.addf %54, %42 : vector<8x8xf32>
    %cst_24 = arith.constant dense<0xFF800000> : vector<8xf32>
    %56 = vector.multi_reduction <maximumf>, %55, %cst_24 [1] : vector<8x8xf32> to vector<8xf32>
    %57 = vector.shape_cast %56 : vector<8xf32> to vector<8x1xf32>
    %58 = vector.broadcast %57 : vector<8x1xf32> to vector<8x8xf32>
    %59 = arith.subf %55, %58 : vector<8x8xf32>
    %60 = math.exp %59 : vector<8x8xf32>
    %cst_25 = arith.constant dense<0.000000e+00> : vector<8xf32>
    %61 = vector.multi_reduction <add>, %60, %cst_25 [1] : vector<8x8xf32> to vector<8xf32>
    %62 = vector.shape_cast %61 : vector<8xf32> to vector<8x1xf32>
    %63 = tpu.reciprocal %62 {approx = true} : vector<8x1xf32> -> vector<8x1xf32>
    %64 = vector.broadcast %63 : vector<8x1xf32> to vector<8x8xf32>
    %65 = arith.mulf %60, %64 : vector<8x8xf32>
    %66 = arith.truncf %65 : vector<8x8xf32> to vector<8x8xbf16>
    %cst_26 = arith.constant dense<0.000000e+00> : vector<8x8xf32>
    %67 = tpu.matmul %66, %51, %cst_26 {dimension_numbers = #tpu.dot_dimension_numbers<[1], [0], [0], [1], [0, 0, 1, 1], [], []>} : vector<8x8xbf16>, vector<8x8xbf16>, vector<8x8xf32> -> vector<8x8xf32>
    %68 = vector.extract_strided_slice %43 {offsets = [0, 8], sizes = [8, 8], strides = [1, 1]} : vector<8x32xf32> to vector<8x8xf32>
    %69 = arith.truncf %68 : vector<8x8xf32> to vector<8x8xbf16>
    %70 = vector.extract_strided_slice %44 {offsets = [0, 8], sizes = [8, 8], strides = [1, 1]} : vector<8x32xf32> to vector<8x8xf32>
    %71 = arith.truncf %70 : vector<8x8xf32> to vector<8x8xbf16>
    %72 = vector.extract_strided_slice %45 {offsets = [0, 8], sizes = [8, 8], strides = [1, 1]} : vector<8x32xf32> to vector<8x8xf32>
    %73 = arith.truncf %72 : vector<8x8xf32> to vector<8x8xbf16>
    %cst_27 = arith.constant dense<0.000000e+00> : vector<8x8xf32>
    %74 = tpu.matmul %69, %71, %cst_27 {dimension_numbers = #tpu.dot_dimension_numbers<[1], [1], [0], [0], [0, 0, 1, 0], [], []>} : vector<8x8xbf16>, vector<8x8xbf16>, vector<8x8xf32> -> vector<8x8xf32>
    %cst_28 = arith.constant 0.353553385 : f32
    %75 = vector.broadcast %cst_28 : f32 to vector<8x8xf32>
    %76 = arith.mulf %74, %75 : vector<8x8xf32>
    %77 = arith.addf %76, %42 : vector<8x8xf32>
    %cst_29 = arith.constant dense<0xFF800000> : vector<8xf32>
    %78 = vector.multi_reduction <maximumf>, %77, %cst_29 [1] : vector<8x8xf32> to vector<8xf32>
    %79 = vector.shape_cast %78 : vector<8xf32> to vector<8x1xf32>
    %80 = vector.broadcast %79 : vector<8x1xf32> to vector<8x8xf32>
    %81 = arith.subf %77, %80 : vector<8x8xf32>
    %82 = math.exp %81 : vector<8x8xf32>
    %cst_30 = arith.constant dense<0.000000e+00> : vector<8xf32>
    %83 = vector.multi_reduction <add>, %82, %cst_30 [1] : vector<8x8xf32> to vector<8xf32>
    %84 = vector.shape_cast %83 : vector<8xf32> to vector<8x1xf32>
    %85 = tpu.reciprocal %84 {approx = true} : vector<8x1xf32> -> vector<8x1xf32>
    %86 = vector.broadcast %85 : vector<8x1xf32> to vector<8x8xf32>
    %87 = arith.mulf %82, %86 : vector<8x8xf32>
    %88 = arith.truncf %87 : vector<8x8xf32> to vector<8x8xbf16>
    %cst_31 = arith.constant dense<0.000000e+00> : vector<8x8xf32>
    %89 = tpu.matmul %88, %73, %cst_31 {dimension_numbers = #tpu.dot_dimension_numbers<[1], [0], [0], [1], [0, 0, 1, 1], [], []>} : vector<8x8xbf16>, vector<8x8xbf16>, vector<8x8xf32> -> vector<8x8xf32>
    %90 = vector.extract_strided_slice %43 {offsets = [0, 16], sizes = [8, 8], strides = [1, 1]} : vector<8x32xf32> to vector<8x8xf32>
    %91 = arith.truncf %90 : vector<8x8xf32> to vector<8x8xbf16>
    %92 = vector.extract_strided_slice %44 {offsets = [0, 16], sizes = [8, 8], strides = [1, 1]} : vector<8x32xf32> to vector<8x8xf32>
    %93 = arith.truncf %92 : vector<8x8xf32> to vector<8x8xbf16>
    %94 = vector.extract_strided_slice %45 {offsets = [0, 16], sizes = [8, 8], strides = [1, 1]} : vector<8x32xf32> to vector<8x8xf32>
    %95 = arith.truncf %94 : vector<8x8xf32> to vector<8x8xbf16>
    %cst_32 = arith.constant dense<0.000000e+00> : vector<8x8xf32>
    %96 = tpu.matmul %91, %93, %cst_32 {dimension_numbers = #tpu.dot_dimension_numbers<[1], [1], [0], [0], [0, 0, 1, 0], [], []>} : vector<8x8xbf16>, vector<8x8xbf16>, vector<8x8xf32> -> vector<8x8xf32>
    %cst_33 = arith.constant 0.353553385 : f32
    %97 = vector.broadcast %cst_33 : f32 to vector<8x8xf32>
    %98 = arith.mulf %96, %97 : vector<8x8xf32>
    %99 = arith.addf %98, %42 : vector<8x8xf32>
    %cst_34 = arith.constant dense<0xFF800000> : vector<8xf32>
    %100 = vector.multi_reduction <maximumf>, %99, %cst_34 [1] : vector<8x8xf32> to vector<8xf32>
    %101 = vector.shape_cast %100 : vector<8xf32> to vector<8x1xf32>
    %102 = vector.broadcast %101 : vector<8x1xf32> to vector<8x8xf32>
    %103 = arith.subf %99, %102 : vector<8x8xf32>
    %104 = math.exp %103 : vector<8x8xf32>
    %cst_35 = arith.constant dense<0.000000e+00> : vector<8xf32>
    %105 = vector.multi_reduction <add>, %104, %cst_35 [1] : vector<8x8xf32> to vector<8xf32>
    %106 = vector.shape_cast %105 : vector<8xf32> to vector<8x1xf32>
    %107 = tpu.reciprocal %106 {approx = true} : vector<8x1xf32> -> vector<8x1xf32>
    %108 = vector.broadcast %107 : vector<8x1xf32> to vector<8x8xf32>
    %109 = arith.mulf %104, %108 : vector<8x8xf32>
    %110 = arith.truncf %109 : vector<8x8xf32> to vector<8x8xbf16>
    %cst_36 = arith.constant dense<0.000000e+00> : vector<8x8xf32>
    %111 = tpu.matmul %110, %95, %cst_36 {dimension_numbers = #tpu.dot_dimension_numbers<[1], [0], [0], [1], [0, 0, 1, 1], [], []>} : vector<8x8xbf16>, vector<8x8xbf16>, vector<8x8xf32> -> vector<8x8xf32>
    %112 = vector.extract_strided_slice %43 {offsets = [0, 24], sizes = [8, 8], strides = [1, 1]} : vector<8x32xf32> to vector<8x8xf32>
    %113 = arith.truncf %112 : vector<8x8xf32> to vector<8x8xbf16>
    %114 = vector.extract_strided_slice %44 {offsets = [0, 24], sizes = [8, 8], strides = [1, 1]} : vector<8x32xf32> to vector<8x8xf32>
    %115 = arith.truncf %114 : vector<8x8xf32> to vector<8x8xbf16>
    %116 = vector.extract_strided_slice %45 {offsets = [0, 24], sizes = [8, 8], strides = [1, 1]} : vector<8x32xf32> to vector<8x8xf32>
    %117 = arith.truncf %116 : vector<8x8xf32> to vector<8x8xbf16>
    %cst_37 = arith.constant dense<0.000000e+00> : vector<8x8xf32>
    %118 = tpu.matmul %113, %115, %cst_37 {dimension_numbers = #tpu.dot_dimension_numbers<[1], [1], [0], [0], [0, 0, 1, 0], [], []>} : vector<8x8xbf16>, vector<8x8xbf16>, vector<8x8xf32> -> vector<8x8xf32>
    %cst_38 = arith.constant 0.353553385 : f32
    %119 = vector.broadcast %cst_38 : f32 to vector<8x8xf32>
    %120 = arith.mulf %118, %119 : vector<8x8xf32>
    %121 = arith.addf %120, %42 : vector<8x8xf32>
    %cst_39 = arith.constant dense<0xFF800000> : vector<8xf32>
    %122 = vector.multi_reduction <maximumf>, %121, %cst_39 [1] : vector<8x8xf32> to vector<8xf32>
    %123 = vector.shape_cast %122 : vector<8xf32> to vector<8x1xf32>
    %124 = vector.broadcast %123 : vector<8x1xf32> to vector<8x8xf32>
    %125 = arith.subf %121, %124 : vector<8x8xf32>
    %126 = math.exp %125 : vector<8x8xf32>
    %cst_40 = arith.constant dense<0.000000e+00> : vector<8xf32>
    %127 = vector.multi_reduction <add>, %126, %cst_40 [1] : vector<8x8xf32> to vector<8xf32>
    %128 = vector.shape_cast %127 : vector<8xf32> to vector<8x1xf32>
    %129 = tpu.reciprocal %128 {approx = true} : vector<8x1xf32> -> vector<8x1xf32>
    %130 = vector.broadcast %129 : vector<8x1xf32> to vector<8x8xf32>
    %131 = arith.mulf %126, %130 : vector<8x8xf32>
    %132 = arith.truncf %131 : vector<8x8xf32> to vector<8x8xbf16>
    %cst_41 = arith.constant dense<0.000000e+00> : vector<8x8xf32>
    %133 = tpu.matmul %132, %117, %cst_41 {dimension_numbers = #tpu.dot_dimension_numbers<[1], [0], [0], [1], [0, 0, 1, 1], [], []>} : vector<8x8xbf16>, vector<8x8xbf16>, vector<8x8xf32> -> vector<8x8xf32>
    %134 = tpu.concatenate %67, %89, %111, %133 in 1 : vector<8x8xf32>, vector<8x8xf32>, vector<8x8xf32>, vector<8x8xf32> -> vector<8x32xf32>
    %c1 = arith.constant 1 : index
    %c0_42 = arith.constant 0 : index
    %c0_43 = arith.constant 0 : index
    %135 = vector.load %arg22[%c1, %c0_42, %c0_43] : memref<2x8x8xf32, #tpu.memory_space<vmem>>, vector<1x8x8xf32>
    %136 = vector.shape_cast %135 : vector<1x8x8xf32> to vector<8x8xf32>
    %137 = vector.extract_strided_slice %38 {offsets = [8, 0], sizes = [8, 32], strides = [1, 1]} : vector<16x32xf32> to vector<8x32xf32>
    %138 = vector.extract_strided_slice %39 {offsets = [8, 0], sizes = [8, 32], strides = [1, 1]} : vector<16x32xf32> to vector<8x32xf32>
    %139 = vector.extract_strided_slice %40 {offsets = [8, 0], sizes = [8, 32], strides = [1, 1]} : vector<16x32xf32> to vector<8x32xf32>
    %140 = vector.extract_strided_slice %137 {offsets = [0, 0], sizes = [8, 8], strides = [1, 1]} : vector<8x32xf32> to vector<8x8xf32>
    %141 = arith.truncf %140 : vector<8x8xf32> to vector<8x8xbf16>
    %142 = vector.extract_strided_slice %138 {offsets = [0, 0], sizes = [8, 8], strides = [1, 1]} : vector<8x32xf32> to vector<8x8xf32>
    %143 = arith.truncf %142 : vector<8x8xf32> to vector<8x8xbf16>
    %144 = vector.extract_strided_slice %139 {offsets = [0, 0], sizes = [8, 8], strides = [1, 1]} : vector<8x32xf32> to vector<8x8xf32>
    %145 = arith.truncf %144 : vector<8x8xf32> to vector<8x8xbf16>
    %cst_44 = arith.constant dense<0.000000e+00> : vector<8x8xf32>
    %146 = tpu.matmul %141, %143, %cst_44 {dimension_numbers = #tpu.dot_dimension_numbers<[1], [1], [0], [0], [0, 0, 1, 0], [], []>} : vector<8x8xbf16>, vector<8x8xbf16>, vector<8x8xf32> -> vector<8x8xf32>
    %cst_45 = arith.constant 0.353553385 : f32
    %147 = vector.broadcast %cst_45 : f32 to vector<8x8xf32>
    %148 = arith.mulf %146, %147 : vector<8x8xf32>
    %149 = arith.addf %148, %136 : vector<8x8xf32>
    %cst_46 = arith.constant dense<0xFF800000> : vector<8xf32>
    %150 = vector.multi_reduction <maximumf>, %149, %cst_46 [1] : vector<8x8xf32> to vector<8xf32>
    %151 = vector.shape_cast %150 : vector<8xf32> to vector<8x1xf32>
    %152 = vector.broadcast %151 : vector<8x1xf32> to vector<8x8xf32>
    %153 = arith.subf %149, %152 : vector<8x8xf32>
    %154 = math.exp %153 : vector<8x8xf32>
    %cst_47 = arith.constant dense<0.000000e+00> : vector<8xf32>
    %155 = vector.multi_reduction <add>, %154, %cst_47 [1] : vector<8x8xf32> to vector<8xf32>
    %156 = vector.shape_cast %155 : vector<8xf32> to vector<8x1xf32>
    %157 = tpu.reciprocal %156 {approx = true} : vector<8x1xf32> -> vector<8x1xf32>
    %158 = vector.broadcast %157 : vector<8x1xf32> to vector<8x8xf32>
    %159 = arith.mulf %154, %158 : vector<8x8xf32>
    %160 = arith.truncf %159 : vector<8x8xf32> to vector<8x8xbf16>
    %cst_48 = arith.constant dense<0.000000e+00> : vector<8x8xf32>
    %161 = tpu.matmul %160, %145, %cst_48 {dimension_numbers = #tpu.dot_dimension_numbers<[1], [0], [0], [1], [0, 0, 1, 1], [], []>} : vector<8x8xbf16>, vector<8x8xbf16>, vector<8x8xf32> -> vector<8x8xf32>
    %162 = vector.extract_strided_slice %137 {offsets = [0, 8], sizes = [8, 8], strides = [1, 1]} : vector<8x32xf32> to vector<8x8xf32>
    %163 = arith.truncf %162 : vector<8x8xf32> to vector<8x8xbf16>
    %164 = vector.extract_strided_slice %138 {offsets = [0, 8], sizes = [8, 8], strides = [1, 1]} : vector<8x32xf32> to vector<8x8xf32>
    %165 = arith.truncf %164 : vector<8x8xf32> to vector<8x8xbf16>
    %166 = vector.extract_strided_slice %139 {offsets = [0, 8], sizes = [8, 8], strides = [1, 1]} : vector<8x32xf32> to vector<8x8xf32>
    %167 = arith.truncf %166 : vector<8x8xf32> to vector<8x8xbf16>
    %cst_49 = arith.constant dense<0.000000e+00> : vector<8x8xf32>
    %168 = tpu.matmul %163, %165, %cst_49 {dimension_numbers = #tpu.dot_dimension_numbers<[1], [1], [0], [0], [0, 0, 1, 0], [], []>} : vector<8x8xbf16>, vector<8x8xbf16>, vector<8x8xf32> -> vector<8x8xf32>
    %cst_50 = arith.constant 0.353553385 : f32
    %169 = vector.broadcast %cst_50 : f32 to vector<8x8xf32>
    %170 = arith.mulf %168, %169 : vector<8x8xf32>
    %171 = arith.addf %170, %136 : vector<8x8xf32>
    %cst_51 = arith.constant dense<0xFF800000> : vector<8xf32>
    %172 = vector.multi_reduction <maximumf>, %171, %cst_51 [1] : vector<8x8xf32> to vector<8xf32>
    %173 = vector.shape_cast %172 : vector<8xf32> to vector<8x1xf32>
    %174 = vector.broadcast %173 : vector<8x1xf32> to vector<8x8xf32>
    %175 = arith.subf %171, %174 : vector<8x8xf32>
    %176 = math.exp %175 : vector<8x8xf32>
    %cst_52 = arith.constant dense<0.000000e+00> : vector<8xf32>
    %177 = vector.multi_reduction <add>, %176, %cst_52 [1] : vector<8x8xf32> to vector<8xf32>
    %178 = vector.shape_cast %177 : vector<8xf32> to vector<8x1xf32>
    %179 = tpu.reciprocal %178 {approx = true} : vector<8x1xf32> -> vector<8x1xf32>
    %180 = vector.broadcast %179 : vector<8x1xf32> to vector<8x8xf32>
    %181 = arith.mulf %176, %180 : vector<8x8xf32>
    %182 = arith.truncf %181 : vector<8x8xf32> to vector<8x8xbf16>
    %cst_53 = arith.constant dense<0.000000e+00> : vector<8x8xf32>
    %183 = tpu.matmul %182, %167, %cst_53 {dimension_numbers = #tpu.dot_dimension_numbers<[1], [0], [0], [1], [0, 0, 1, 1], [], []>} : vector<8x8xbf16>, vector<8x8xbf16>, vector<8x8xf32> -> vector<8x8xf32>
    %184 = vector.extract_strided_slice %137 {offsets = [0, 16], sizes = [8, 8], strides = [1, 1]} : vector<8x32xf32> to vector<8x8xf32>
    %185 = arith.truncf %184 : vector<8x8xf32> to vector<8x8xbf16>
    %186 = vector.extract_strided_slice %138 {offsets = [0, 16], sizes = [8, 8], strides = [1, 1]} : vector<8x32xf32> to vector<8x8xf32>
    %187 = arith.truncf %186 : vector<8x8xf32> to vector<8x8xbf16>
    %188 = vector.extract_strided_slice %139 {offsets = [0, 16], sizes = [8, 8], strides = [1, 1]} : vector<8x32xf32> to vector<8x8xf32>
    %189 = arith.truncf %188 : vector<8x8xf32> to vector<8x8xbf16>
    %cst_54 = arith.constant dense<0.000000e+00> : vector<8x8xf32>
    %190 = tpu.matmul %185, %187, %cst_54 {dimension_numbers = #tpu.dot_dimension_numbers<[1], [1], [0], [0], [0, 0, 1, 0], [], []>} : vector<8x8xbf16>, vector<8x8xbf16>, vector<8x8xf32> -> vector<8x8xf32>
    %cst_55 = arith.constant 0.353553385 : f32
    %191 = vector.broadcast %cst_55 : f32 to vector<8x8xf32>
    %192 = arith.mulf %190, %191 : vector<8x8xf32>
    %193 = arith.addf %192, %136 : vector<8x8xf32>
    %cst_56 = arith.constant dense<0xFF800000> : vector<8xf32>
    %194 = vector.multi_reduction <maximumf>, %193, %cst_56 [1] : vector<8x8xf32> to vector<8xf32>
    %195 = vector.shape_cast %194 : vector<8xf32> to vector<8x1xf32>
    %196 = vector.broadcast %195 : vector<8x1xf32> to vector<8x8xf32>
    %197 = arith.subf %193, %196 : vector<8x8xf32>
    %198 = math.exp %197 : vector<8x8xf32>
    %cst_57 = arith.constant dense<0.000000e+00> : vector<8xf32>
    %199 = vector.multi_reduction <add>, %198, %cst_57 [1] : vector<8x8xf32> to vector<8xf32>
    %200 = vector.shape_cast %199 : vector<8xf32> to vector<8x1xf32>
    %201 = tpu.reciprocal %200 {approx = true} : vector<8x1xf32> -> vector<8x1xf32>
    %202 = vector.broadcast %201 : vector<8x1xf32> to vector<8x8xf32>
    %203 = arith.mulf %198, %202 : vector<8x8xf32>
    %204 = arith.truncf %203 : vector<8x8xf32> to vector<8x8xbf16>
    %cst_58 = arith.constant dense<0.000000e+00> : vector<8x8xf32>
    %205 = tpu.matmul %204, %189, %cst_58 {dimension_numbers = #tpu.dot_dimension_numbers<[1], [0], [0], [1], [0, 0, 1, 1], [], []>} : vector<8x8xbf16>, vector<8x8xbf16>, vector<8x8xf32> -> vector<8x8xf32>
    %206 = vector.extract_strided_slice %137 {offsets = [0, 24], sizes = [8, 8], strides = [1, 1]} : vector<8x32xf32> to vector<8x8xf32>
    %207 = arith.truncf %206 : vector<8x8xf32> to vector<8x8xbf16>
    %208 = vector.extract_strided_slice %138 {offsets = [0, 24], sizes = [8, 8], strides = [1, 1]} : vector<8x32xf32> to vector<8x8xf32>
    %209 = arith.truncf %208 : vector<8x8xf32> to vector<8x8xbf16>
    %210 = vector.extract_strided_slice %139 {offsets = [0, 24], sizes = [8, 8], strides = [1, 1]} : vector<8x32xf32> to vector<8x8xf32>
    %211 = arith.truncf %210 : vector<8x8xf32> to vector<8x8xbf16>
    %cst_59 = arith.constant dense<0.000000e+00> : vector<8x8xf32>
    %212 = tpu.matmul %207, %209, %cst_59 {dimension_numbers = #tpu.dot_dimension_numbers<[1], [1], [0], [0], [0, 0, 1, 0], [], []>} : vector<8x8xbf16>, vector<8x8xbf16>, vector<8x8xf32> -> vector<8x8xf32>
    %cst_60 = arith.constant 0.353553385 : f32
    %213 = vector.broadcast %cst_60 : f32 to vector<8x8xf32>
    %214 = arith.mulf %212, %213 : vector<8x8xf32>
    %215 = arith.addf %214, %136 : vector<8x8xf32>
    %cst_61 = arith.constant dense<0xFF800000> : vector<8xf32>
    %216 = vector.multi_reduction <maximumf>, %215, %cst_61 [1] : vector<8x8xf32> to vector<8xf32>
    %217 = vector.shape_cast %216 : vector<8xf32> to vector<8x1xf32>
    %218 = vector.broadcast %217 : vector<8x1xf32> to vector<8x8xf32>
    %219 = arith.subf %215, %218 : vector<8x8xf32>
    %220 = math.exp %219 : vector<8x8xf32>
    %cst_62 = arith.constant dense<0.000000e+00> : vector<8xf32>
    %221 = vector.multi_reduction <add>, %220, %cst_62 [1] : vector<8x8xf32> to vector<8xf32>
    %222 = vector.shape_cast %221 : vector<8xf32> to vector<8x1xf32>
    %223 = tpu.reciprocal %222 {approx = true} : vector<8x1xf32> -> vector<8x1xf32>
    %224 = vector.broadcast %223 : vector<8x1xf32> to vector<8x8xf32>
    %225 = arith.mulf %220, %224 : vector<8x8xf32>
    %226 = arith.truncf %225 : vector<8x8xf32> to vector<8x8xbf16>
    %cst_63 = arith.constant dense<0.000000e+00> : vector<8x8xf32>
    %227 = tpu.matmul %226, %211, %cst_63 {dimension_numbers = #tpu.dot_dimension_numbers<[1], [0], [0], [1], [0, 0, 1, 1], [], []>} : vector<8x8xbf16>, vector<8x8xbf16>, vector<8x8xf32> -> vector<8x8xf32>
    %228 = tpu.concatenate %161, %183, %205, %227 in 1 : vector<8x8xf32>, vector<8x8xf32>, vector<8x8xf32>, vector<8x8xf32> -> vector<8x32xf32>
    %229 = tpu.concatenate %134, %228 in 0 : vector<8x32xf32>, vector<8x32xf32> -> vector<16x32xf32>
    %230 = arith.truncf %229 : vector<16x32xf32> to vector<16x32xbf16>
    %c0_64 = arith.constant 0 : index
    %c0_65 = arith.constant 0 : index
    %c0_66 = arith.constant 0 : index
    %231 = vector.load %arg8[%c0_64, %c0_65, %c0_66] : memref<1x32x32xbf16, #tpu.memory_space<vmem>>, vector<1x32x32xbf16>
    %232 = vector.shape_cast %231 : vector<1x32x32xbf16> to vector<32x32xbf16>
    %cst_67 = arith.constant dense<0.000000e+00> : vector<16x32xf32>
    %233 = tpu.matmul %230, %232, %cst_67 {dimension_numbers = #tpu.dot_dimension_numbers<[1], [0], [0], [1], [0, 0, 1, 1], [], []>} : vector<16x32xbf16>, vector<32x32xbf16>, vector<16x32xf32> -> vector<16x32xf32>
    %234 = arith.addf %3, %233 : vector<16x32xf32>
    %c0_68 = arith.constant 0 : index
    %c0_69 = arith.constant 0 : index
    %c0_70 = arith.constant 0 : index
    %235 = vector.load %arg9[%c0_68, %c0_69, %c0_70] : memref<1x1x32xf32, #tpu.memory_space<vmem>>, vector<1x1x32xf32>
    %236 = vector.shape_cast %235 : vector<1x1x32xf32> to vector<1x32xf32>
    %237 = vector.broadcast %236 : vector<1x32xf32> to vector<16x32xf32>
    %238 = arith.addf %234, %237 : vector<16x32xf32>
    %c0_71 = arith.constant 0 : index
    %c0_72 = arith.constant 0 : index
    %c0_73 = arith.constant 0 : index
    %239 = vector.load %arg10[%c0_71, %c0_72, %c0_73] : memref<1x1x32xf32, #tpu.memory_space<vmem>>, vector<1x1x32xf32>
    %240 = vector.shape_cast %239 : vector<1x1x32xf32> to vector<1x32xf32>
    %c0_74 = arith.constant 0 : index
    %c0_75 = arith.constant 0 : index
    %c0_76 = arith.constant 0 : index
    %241 = vector.load %arg11[%c0_74, %c0_75, %c0_76] : memref<1x1x32xf32, #tpu.memory_space<vmem>>, vector<1x1x32xf32>
    %242 = vector.shape_cast %241 : vector<1x1x32xf32> to vector<1x32xf32>
    %cst_77 = arith.constant dense<0.000000e+00> : vector<16xf32>
    %243 = vector.multi_reduction <add>, %238, %cst_77 [1] : vector<16x32xf32> to vector<16xf32>
    %244 = vector.shape_cast %243 : vector<16xf32> to vector<16x1xf32>
    %cst_78 = arith.constant 3.200000e+01 : f32
    %245 = vector.broadcast %cst_78 : f32 to vector<16x1xf32>
    %246 = arith.divf %244, %245 : vector<16x1xf32>
    %247 = vector.broadcast %246 : vector<16x1xf32> to vector<16x32xf32>
    %248 = arith.subf %238, %247 : vector<16x32xf32>
    %249 = arith.mulf %248, %248 : vector<16x32xf32>
    %cst_79 = arith.constant dense<0.000000e+00> : vector<16xf32>
    %250 = vector.multi_reduction <add>, %249, %cst_79 [1] : vector<16x32xf32> to vector<16xf32>
    %251 = vector.shape_cast %250 : vector<16xf32> to vector<16x1xf32>
    %cst_80 = arith.constant 3.200000e+01 : f32
    %252 = vector.broadcast %cst_80 : f32 to vector<16x1xf32>
    %253 = arith.divf %251, %252 : vector<16x1xf32>
    %254 = vector.broadcast %246 : vector<16x1xf32> to vector<16x32xf32>
    %255 = arith.subf %238, %254 : vector<16x32xf32>
    %cst_81 = arith.constant 9.99999974E-6 : f32
    %256 = vector.broadcast %cst_81 : f32 to vector<16x1xf32>
    %257 = arith.addf %253, %256 : vector<16x1xf32>
    %258 = math.rsqrt %257 : vector<16x1xf32>
    %259 = vector.broadcast %258 : vector<16x1xf32> to vector<16x32xf32>
    %260 = arith.mulf %255, %259 : vector<16x32xf32>
    %261 = vector.broadcast %240 : vector<1x32xf32> to vector<16x32xf32>
    %262 = arith.mulf %260, %261 : vector<16x32xf32>
    %263 = vector.broadcast %242 : vector<1x32xf32> to vector<16x32xf32>
    %264 = arith.addf %262, %263 : vector<16x32xf32>
    %265 = arith.truncf %264 : vector<16x32xf32> to vector<16x32xbf16>
    %c0_82 = arith.constant 0 : index
    %c0_83 = arith.constant 0 : index
    %c0_84 = arith.constant 0 : index
    %266 = vector.load %arg12[%c0_82, %c0_83, %c0_84] : memref<1x32x128xbf16, #tpu.memory_space<vmem>>, vector<1x32x128xbf16>
    %267 = vector.shape_cast %266 : vector<1x32x128xbf16> to vector<32x128xbf16>
    %cst_85 = arith.constant dense<0.000000e+00> : vector<16x128xf32>
    %268 = tpu.matmul %265, %267, %cst_85 {dimension_numbers = #tpu.dot_dimension_numbers<[1], [0], [0], [1], [0, 0, 1, 1], [], []>} : vector<16x32xbf16>, vector<32x128xbf16>, vector<16x128xf32> -> vector<16x128xf32>
    %c0_86 = arith.constant 0 : index
    %c0_87 = arith.constant 0 : index
    %c0_88 = arith.constant 0 : index
    %269 = vector.load %arg13[%c0_86, %c0_87, %c0_88] : memref<1x1x128xf32, #tpu.memory_space<vmem>>, vector<1x1x128xf32>
    %270 = vector.shape_cast %269 : vector<1x1x128xf32> to vector<1x128xf32>
    %271 = vector.broadcast %270 : vector<1x128xf32> to vector<16x128xf32>
    %272 = arith.addf %268, %271 : vector<16x128xf32>
    %cst_89 = arith.constant 5.000000e-01 : f32
    %273 = vector.broadcast %cst_89 : f32 to vector<16x128xf32>
    %274 = arith.mulf %273, %272 : vector<16x128xf32>
    %cst_90 = arith.constant 4.471500e-02 : f32
    %275 = vector.broadcast %cst_90 : f32 to vector<16x128xf32>
    %276 = arith.mulf %275, %272 : vector<16x128xf32>
    %277 = arith.mulf %276, %272 : vector<16x128xf32>
    %278 = arith.mulf %277, %272 : vector<16x128xf32>
    %279 = arith.addf %272, %278 : vector<16x128xf32>
    %cst_91 = arith.constant 0.797884583 : f32
    %280 = vector.broadcast %cst_91 : f32 to vector<16x128xf32>
    %281 = arith.mulf %280, %279 : vector<16x128xf32>
    %282 = math.tanh %281 : vector<16x128xf32>
    %cst_92 = arith.constant 1.000000e+00 : f32
    %283 = vector.broadcast %cst_92 : f32 to vector<16x128xf32>
    %284 = arith.addf %283, %282 : vector<16x128xf32>
    %285 = arith.mulf %274, %284 : vector<16x128xf32>
    %286 = arith.truncf %285 : vector<16x128xf32> to vector<16x128xbf16>
    %c0_93 = arith.constant 0 : index
    %c0_94 = arith.constant 0 : index
    %c0_95 = arith.constant 0 : index
    %287 = vector.load %arg14[%c0_93, %c0_94, %c0_95] : memref<1x128x32xbf16, #tpu.memory_space<vmem>>, vector<1x128x32xbf16>
    %288 = vector.shape_cast %287 : vector<1x128x32xbf16> to vector<128x32xbf16>
    %cst_96 = arith.constant dense<0.000000e+00> : vector<16x32xf32>
    %289 = tpu.matmul %286, %288, %cst_96 {dimension_numbers = #tpu.dot_dimension_numbers<[1], [0], [0], [1], [0, 0, 1, 1], [], []>} : vector<16x128xbf16>, vector<128x32xbf16>, vector<16x32xf32> -> vector<16x32xf32>
    %290 = arith.addf %238, %289 : vector<16x32xf32>
    %c0_97 = arith.constant 0 : index
    %c0_98 = arith.constant 0 : index
    %c0_99 = arith.constant 0 : index
    %291 = vector.load %arg15[%c0_97, %c0_98, %c0_99] : memref<1x1x32xf32, #tpu.memory_space<vmem>>, vector<1x1x32xf32>
    %292 = vector.shape_cast %291 : vector<1x1x32xf32> to vector<1x32xf32>
    %293 = vector.broadcast %292 : vector<1x32xf32> to vector<16x32xf32>
    %294 = arith.addf %290, %293 : vector<16x32xf32>
    %c0_100 = arith.constant 0 : index
    %c0_101 = arith.constant 0 : index
    %295 = vector.load %arg21[%c0_100, %c0_101] : memref<16x32xf32, #tpu.memory_space<vmem>>, vector<16x32xf32>
    tpu.vector_store %arg21[%c0_100, %c0_101], %294 {strides = array<i32>} : memref<16x32xf32, #tpu.memory_space<vmem>>, vector<16x32xf32>,
    %c1_i32 = arith.constant 1 : i32
    %296 = arith.cmpi eq, %arg1, %c1_i32 : i32
    %297 = arith.extui %296 : i1 to i32
    %c0_i32_102 = arith.constant 0 : i32
    %298 = arith.cmpi ne, %297, %c0_i32_102 : i32
    scf.if %298 {
      %c0_103 = arith.constant 0 : index
      %c0_104 = arith.constant 0 : index
      %299 = vector.load %arg16[%c0_103, %c0_104] : memref<1x32xf32, #tpu.memory_space<vmem>>, vector<1x32xf32>
      %c0_105 = arith.constant 0 : index
      %c0_106 = arith.constant 0 : index
      %300 = vector.load %arg17[%c0_105, %c0_106] : memref<1x32xf32, #tpu.memory_space<vmem>>, vector<1x32xf32>
      %cst_107 = arith.constant dense<0.000000e+00> : vector<16xf32>
      %301 = vector.multi_reduction <add>, %294, %cst_107 [1] : vector<16x32xf32> to vector<16xf32>
      %302 = vector.shape_cast %301 : vector<16xf32> to vector<16x1xf32>
      %cst_108 = arith.constant 3.200000e+01 : f32
      %303 = vector.broadcast %cst_108 : f32 to vector<16x1xf32>
      %304 = arith.divf %302, %303 : vector<16x1xf32>
      %305 = vector.broadcast %304 : vector<16x1xf32> to vector<16x32xf32>
      %306 = arith.subf %294, %305 : vector<16x32xf32>
      %307 = arith.mulf %306, %306 : vector<16x32xf32>
      %cst_109 = arith.constant dense<0.000000e+00> : vector<16xf32>
      %308 = vector.multi_reduction <add>, %307, %cst_109 [1] : vector<16x32xf32> to vector<16xf32>
      %309 = vector.shape_cast %308 : vector<16xf32> to vector<16x1xf32>
      %cst_110 = arith.constant 3.200000e+01 : f32
      %310 = vector.broadcast %cst_110 : f32 to vector<16x1xf32>
      %311 = arith.divf %309, %310 : vector<16x1xf32>
      %312 = vector.broadcast %304 : vector<16x1xf32> to vector<16x32xf32>
      %313 = arith.subf %294, %312 : vector<16x32xf32>
      %cst_111 = arith.constant 9.99999974E-6 : f32
      %314 = vector.broadcast %cst_111 : f32 to vector<16x1xf32>
      %315 = arith.addf %311, %314 : vector<16x1xf32>
      %316 = math.rsqrt %315 : vector<16x1xf32>
      %317 = vector.broadcast %316 : vector<16x1xf32> to vector<16x32xf32>
      %318 = arith.mulf %313, %317 : vector<16x32xf32>
      %319 = vector.broadcast %299 : vector<1x32xf32> to vector<16x32xf32>
      %320 = arith.mulf %318, %319 : vector<16x32xf32>
      %321 = vector.broadcast %300 : vector<1x32xf32> to vector<16x32xf32>
      %322 = arith.addf %320, %321 : vector<16x32xf32>
      %323 = vector.extract_strided_slice %322 {offsets = [0, 0], sizes = [8, 32], strides = [1, 1]} : vector<16x32xf32> to vector<8x32xf32>
      %cst_112 = arith.constant dense<0.000000e+00> : vector<32xf32>
      %324 = vector.multi_reduction <add>, %323, %cst_112 [0] : vector<8x32xf32> to vector<32xf32>
      %325 = vector.shape_cast %324 : vector<32xf32> to vector<1x32xf32>
      %cst_113 = arith.constant 8.000000e+00 : f32
      %326 = vector.broadcast %cst_113 : f32 to vector<1x32xf32>
      %327 = arith.divf %325, %326 : vector<1x32xf32>
      %328 = vector.extract_strided_slice %322 {offsets = [8, 0], sizes = [8, 32], strides = [1, 1]} : vector<16x32xf32> to vector<8x32xf32>
      %cst_114 = arith.constant dense<0.000000e+00> : vector<32xf32>
      %329 = vector.multi_reduction <add>, %328, %cst_114 [0] : vector<8x32xf32> to vector<32xf32>
      %330 = vector.shape_cast %329 : vector<32xf32> to vector<1x32xf32>
      %cst_115 = arith.constant 8.000000e+00 : f32
      %331 = vector.broadcast %cst_115 : f32 to vector<1x32xf32>
      %332 = arith.divf %330, %331 : vector<1x32xf32>
      %333 = tpu.concatenate %327, %332 in 0 : vector<1x32xf32>, vector<1x32xf32> -> vector<2x32xf32>
      %c0_116 = arith.constant 0 : index
      %c0_117 = arith.constant 0 : index
      %334 = vector.load %arg18[%c0_116, %c0_117] : memref<1x32xf32, #tpu.memory_space<vmem>>, vector<1x32xf32>
      %335 = vector.broadcast %334 : vector<1x32xf32> to vector<2x32xf32>
      %336 = arith.mulf %333, %335 : vector<2x32xf32>
      %cst_118 = arith.constant dense<0.000000e+00> : vector<2xf32>
      %337 = vector.multi_reduction <add>, %336, %cst_118 [1] : vector<2x32xf32> to vector<2xf32>
      %338 = vector.shape_cast %337 : vector<2xf32> to vector<2x1xf32>
      %c0_119 = arith.constant 0 : index
      %c0_120 = arith.constant 0 : index
      %339 = vector.load %arg19[%c0_119, %c0_120] : memref<1x1xf32, #tpu.memory_space<vmem>>, vector<1x1xf32>
      %340 = vector.broadcast %339 : vector<1x1xf32> to vector<2x1xf32>
      %341 = arith.addf %338, %340 : vector<2x1xf32>
      %cst_121 = arith.constant 0.000000e+00 : f32
      %342 = vector.broadcast %cst_121 : f32 to vector<2x1xf32>
      %343 = arith.subf %342, %341 : vector<2x1xf32>
      %344 = math.exp %343 : vector<2x1xf32>
      %cst_122 = arith.constant 1.000000e+00 : f32
      %345 = vector.broadcast %cst_122 : f32 to vector<2x1xf32>
      %346 = arith.addf %345, %344 : vector<2x1xf32>
      %cst_123 = arith.constant 1.000000e+00 : f32
      %347 = vector.broadcast %cst_123 : f32 to vector<2x1xf32>
      %348 = arith.divf %347, %346 : vector<2x1xf32>
      %c0_124 = arith.constant 0 : index
      %c0_125 = arith.constant 0 : index
      %349 = vector.load %arg20[%c0_124, %c0_125] : memref<2x1xf32, #tpu.memory_space<vmem>>, vector<2x1xf32>
      tpu.vector_store %arg20[%c0_124, %c0_125], %348 {strides = array<i32>} : memref<2x1xf32, #tpu.memory_space<vmem>>, vector<2x1xf32>,
    } else {
    }
    return
  }
  func.func @transform_0(%arg0: i32, %arg1: i32) -> (i32, i32) {
    %c0_i32 = arith.constant 0 : i32
    %c0_i32_0 = arith.constant 0 : i32
    return %arg0, %c0_i32 : i32, i32
  }
  func.func @transform_1(%arg0: i32, %arg1: i32) -> (i32, i32) {
    %c0_i32 = arith.constant 0 : i32
    %c0_i32_0 = arith.constant 0 : i32
    return %arg0, %c0_i32 : i32, i32
  }
  func.func @transform_2(%arg0: i32, %arg1: i32) -> (i32, i32, i32) {
    %c0_i32 = arith.constant 0 : i32
    %c0_i32_0 = arith.constant 0 : i32
    %c0_i32_1 = arith.constant 0 : i32
    return %arg1, %c0_i32, %c0_i32_0 : i32, i32, i32
  }
  func.func @transform_3(%arg0: i32, %arg1: i32) -> (i32, i32, i32) {
    %c0_i32 = arith.constant 0 : i32
    %c0_i32_0 = arith.constant 0 : i32
    %c0_i32_1 = arith.constant 0 : i32
    return %arg1, %c0_i32, %c0_i32_0 : i32, i32, i32
  }
  func.func @transform_4(%arg0: i32, %arg1: i32) -> (i32, i32, i32) {
    %c0_i32 = arith.constant 0 : i32
    %c0_i32_0 = arith.constant 0 : i32
    %c0_i32_1 = arith.constant 0 : i32
    return %arg1, %c0_i32, %c0_i32_0 : i32, i32, i32
  }
  func.func @transform_5(%arg0: i32, %arg1: i32) -> (i32, i32, i32) {
    %c0_i32 = arith.constant 0 : i32
    %c0_i32_0 = arith.constant 0 : i32
    %c0_i32_1 = arith.constant 0 : i32
    return %arg1, %c0_i32, %c0_i32_0 : i32, i32, i32
  }
  func.func @transform_6(%arg0: i32, %arg1: i32) -> (i32, i32, i32) {
    %c0_i32 = arith.constant 0 : i32
    %c0_i32_0 = arith.constant 0 : i32
    %c0_i32_1 = arith.constant 0 : i32
    return %arg1, %c0_i32, %c0_i32_0 : i32, i32, i32
  }
  func.func @transform_7(%arg0: i32, %arg1: i32) -> (i32, i32, i32) {
    %c0_i32 = arith.constant 0 : i32
    %c0_i32_0 = arith.constant 0 : i32
    %c0_i32_1 = arith.constant 0 : i32
    return %arg1, %c0_i32, %c0_i32_0 : i32, i32, i32
  }
  func.func @transform_8(%arg0: i32, %arg1: i32) -> (i32, i32, i32) {
    %c0_i32 = arith.constant 0 : i32
    %c0_i32_0 = arith.constant 0 : i32
    %c0_i32_1 = arith.constant 0 : i32
    return %arg1, %c0_i32, %c0_i32_0 : i32, i32, i32
  }
  func.func @transform_9(%arg0: i32, %arg1: i32) -> (i32, i32, i32) {
    %c0_i32 = arith.constant 0 : i32
    %c0_i32_0 = arith.constant 0 : i32
    %c0_i32_1 = arith.constant 0 : i32
    return %arg1, %c0_i32, %c0_i32_0 : i32, i32, i32
  }
  func.func @transform_10(%arg0: i32, %arg1: i32) -> (i32, i32, i32) {
    %c0_i32 = arith.constant 0 : i32
    %c0_i32_0 = arith.constant 0 : i32
    %c0_i32_1 = arith.constant 0 : i32
    return %arg1, %c0_i32, %c0_i32_0 : i32, i32, i32
  }
  func.func @transform_11(%arg0: i32, %arg1: i32) -> (i32, i32, i32) {
    %c0_i32 = arith.constant 0 : i32
    %c0_i32_0 = arith.constant 0 : i32
    %c0_i32_1 = arith.constant 0 : i32
    return %arg1, %c0_i32, %c0_i32_0 : i32, i32, i32
  }
  func.func @transform_12(%arg0: i32, %arg1: i32) -> (i32, i32, i32) {
    %c0_i32 = arith.constant 0 : i32
    %c0_i32_0 = arith.constant 0 : i32
    %c0_i32_1 = arith.constant 0 : i32
    return %arg1, %c0_i32, %c0_i32_0 : i32, i32, i32
  }
  func.func @transform_13(%arg0: i32, %arg1: i32) -> (i32, i32, i32) {
    %c0_i32 = arith.constant 0 : i32
    %c0_i32_0 = arith.constant 0 : i32
    %c0_i32_1 = arith.constant 0 : i32
    return %arg1, %c0_i32, %c0_i32_0 : i32, i32, i32
  }
  func.func @transform_14(%arg0: i32, %arg1: i32) -> (i32, i32) {
    %c0_i32 = arith.constant 0 : i32
    %c0_i32_0 = arith.constant 0 : i32
    %c0_i32_1 = arith.constant 0 : i32
    return %c0_i32, %c0_i32_0 : i32, i32
  }
  func.func @transform_15(%arg0: i32, %arg1: i32) -> (i32, i32) {
    %c0_i32 = arith.constant 0 : i32
    %c0_i32_0 = arith.constant 0 : i32
    %c0_i32_1 = arith.constant 0 : i32
    return %c0_i32, %c0_i32_0 : i32, i32
  }
  func.func @transform_16(%arg0: i32, %arg1: i32) -> (i32, i32) {
    %c0_i32 = arith.constant 0 : i32
    %c0_i32_0 = arith.constant 0 : i32
    %c0_i32_1 = arith.constant 0 : i32
    return %c0_i32, %c0_i32_0 : i32, i32
  }
  func.func @transform_17(%arg0: i32, %arg1: i32) -> (i32, i32) {
    %c0_i32 = arith.constant 0 : i32
    %c0_i32_0 = arith.constant 0 : i32
    %c0_i32_1 = arith.constant 0 : i32
    return %c0_i32, %c0_i32_0 : i32, i32
  }
  func.func @transform_18(%arg0: i32, %arg1: i32) -> (i32, i32) {
    %c0_i32 = arith.constant 0 : i32
    %c0_i32_0 = arith.constant 0 : i32
    return %arg0, %c0_i32 : i32, i32
  }
}

</mosaic_0001>

<bundles_post_ra>
// kernel: tpu_custom_call.1
= control target key start
LH: loop header
LB: loop body
LE: loop exit
PB: predicated region body
PF: predicated region fallthrough
CT: control target
= control target key end

     0   :  { %s3014_s29 = smov 0   ;;  %s3016_s30 = smov 0   ;;  %s3417_s0 = inlined_call_operand.vmem [shape: f32[2,8], index: 0, kind: input, shape index: {}]   ;;  %s3418_s1 = inlined_call_operand.vmem [shape: f32[16,32], index: 1, kind: input, shape index: {}]   ;;  %s3419_s2 = inlined_call_operand.vmem [shape: f32[2,1,32], index: 2, kind: input, shape index: {}]   ;;  %s3420_s3 = inlined_call_operand.vmem [shape: f32[2,1,32], index: 3, kind: input, shape index: {}]   ;;  %s3421_s4 = inlined_call_operand.vmem [shape: bf16[2,32,96], index: 4, kind: input, shape index: {}]   ;;  %s3422_s5 = inlined_call_operand.vmem [shape: f32[2,1,96], index: 5, kind: input, shape index: {}]   ;;  %s3423_s6 = inlined_call_operand.vmem [shape: bf16[2,32,32], index: 6, kind: input, shape index: {}]   ;;  %s3424_s7 = inlined_call_operand.vmem [shape: f32[2,1,32], index: 7, kind: input, shape index: {}]   ;;  %s3425_s8 = inlined_call_operand.vmem [shape: f32[2,1,32], index: 8, kind: input, shape index: {}]   ;;  %s3426_s9 = inlined_call_operand.vmem [shape: f32[2,1,32], index: 9, kind: input, shape index: {}]   ;;  %s3427_s10 = inlined_call_operand.vmem [shape: bf16[2,32,128], index: 10, kind: input, shape index: {}]   ;;  %s3428_s11 = inlined_call_operand.vmem [shape: f32[2,1,128], index: 11, kind: input, shape index: {}]   ;;  %s3429_s12 = inlined_call_operand.vmem [shape: bf16[2,128,32], index: 12, kind: input, shape index: {}]   ;;  %s3430_s13 = inlined_call_operand.vmem [shape: f32[2,1,32], index: 13, kind: input, shape index: {}]   ;;  %s3431_s14 = inlined_call_operand.vmem [shape: f32[1,32], index: 14, kind: input, shape index: {}]   ;;  %s3432_s15 = inlined_call_operand.vmem [shape: f32[1,32], index: 15, kind: input, shape index: {}]   ;;  %s3433_s16 = inlined_call_operand.vmem [shape: f32[1,32], index: 16, kind: input, shape index: {}]   ;;  %s3434_s17 = inlined_call_operand.<no memory space> [shape: f32[1,1], index: 17, kind: input, shape index: {}]   ;;  %s3435_s18 = inlined_call_operand.vmem [shape: f32[2,1], index: 18, kind: output, shape index: {}]  }
   0x1   :  { %3440 = sst [smem:[#allocation8_spill]] %s3417_s0  ;;  %v23_v0 = vstv %s3434_s17  ;;  %s3018_s0 = smov 0  }
   0x2   :  { %3441 = sst [smem:[#allocation9_spill]] %s3418_s1  ;;  %24 = vst [vmem:[#allocation4] sm:$0x1] %v23_v0 }
   0x3   :  { %3442 = sst [smem:[#allocation10_spill]] %s3419_s2 }
   0x4   :  { %3443 = sst [smem:[#allocation11_spill]] %s3421_s4 }
   0x5   :  { %3444 = sst [smem:[#allocation12_spill]] %s3423_s6 }
   0x6   :  { %3445 = sst [smem:[#allocation13_spill]] %s3432_s15 }
   0x7   :  { %3446 = sst [smem:[#allocation14_spill]] %s3433_s16 }
   0x8   :  { %3447 = sst [smem:[#allocation15_spill]] %s3435_s18 }
   0x9 LB: > { %3448 = sst [smem:[#allocation5_spill]] %s2893_s30  ;;  %s39_s17 = sadd.s32 1, %s2893_s30  ;;  %s2897_s0 = sphi %s3018_s0, %s30_s0   ;;  %s2893_s30 = sphi %s3016_s30, %s3466_s30   ;;  %s2889_s29 = sphi %s3014_s29, %s3465_s29  }
   0xa   : > { %3449 = sst [smem:[#allocation6_spill]] %s2897_s0  ;;  %p2498_p0 = scmp.ge.s32.totalorder %s2897_s0, 1 }
   0xb   : > { %p40_p1 = scmp.ge.s32.totalorder %s39_s17, 2  ;;  %p640_p2 = scmp.lt.s32.totalorder %s2897_s0, 3 }
   0xd   : > { %s3468_s17 = smov (%p40_p1, %s39_s17), 0  ;;  %p641_p3 = pnand %p2498_p0, %p640_p2 }
   0xe   : > { %3450 = sst [smem:[#allocation7_spill]] %s3468_s17  ;;  %p751_p4 = scmp.lt.s32.totalorder (!%p641_p3), %s2889_s29, 1 }
   0xf   : > { %644 = sbr.rel (%p641_p3) target bundleno = 3192 (0xc78), region = 92  ;;  %s3452_s4 = sld [smem:[#allocation11_spill]] (!%p641_p3) }
  0x10   : > { %s3453_s6 = sld [smem:[#allocation12_spill]] (!%p641_p3)  ;;  %p2507_p5 = scmp.ne.s32.totalorder (!%p641_p3), %s2889_s29, 0 }
  0x16   : > { %s3036_s19 = scalar_select %p751_p4, %s2889_s29, 1 }
  0x17   : > { %803 = sbr.rel (%p2507_p5) target bundleno = 39 (0x27), region = 96  ;;  %s3454_s1 = sld [smem:[#allocation9_spill]] (!%p2507_p5)  ;;  %vm806_vm0 = vcmask (!%p2507_p5), 261120   ;;  %v809_v3 = vlaneseq (!%p2507_p5)  ;;  %v2899_v8 = vmov (!%p2507_p5), -1e+09   ;;  %vm821_vm2 = vcmask (!%p2507_p5), 64512  }
  0x18   : > { %s2559_s25 = sshll.u32 %s3036_s19, 4  ;;  %s775_s16 = scalar_lea.vmem %s3425_s8, %s3036_s19 }
  0x19   : > { %s3054_s17 = scalar_lea.vmem %s3452_s4, %s2559_s25  ;;  %s3059_s18 = scalar_lea.vmem %s3453_s6, %s2559_s25  ;;  %v810_v4 = vshrl.u32 (!%p2507_p5), %v809_v3, 7  ;;  %v812_v5 = vand.u32 (!%p2507_p5), 127, %v809_v3 }
  0x1a   : > { %s778_s28 = scalar_lea.vmem %s3426_s9, %s3036_s19  ;;  %s3076_s4 = scalar_lea.vmem %s3427_s10, %s2559_s25 }
  0x1b   : > { %s786_s6 = scalar_lea.vmem %s3428_s11, %s3036_s19  ;;  %s2562_s15 = sshll.u32 %s3036_s19, 6  ;;  %vm813_vm1 = vcmp.le.s32.totalorder (!%p2507_p5), %v812_v5, %v810_v4 }
  0x1c   : > { %s3086_s2 = scalar_lea.vmem %s3429_s12, %s2562_s15  ;;  %s794_s26 = scalar_lea.vmem %s3430_s13, %s3036_s19  ;;  %v814_v9 = vsel (!%p2507_p5), %vm813_vm1, 0.0, %v2899_v8 }
  0x1d   : > { %v804_v1 = vld [vmem:[%s3454_s1] sm:$0xff] (!%p2507_p5)  ;;  %v805_v2 = vld [vmem:[%s3454_s1 + $0x8] sm:$0xff] (!%p2507_p5)  ;;  %s3455_s22 = sld [smem:[#allocation8_spill]] (!%p2507_p5) }
  0x1e   : > { %807 = vst.msk [vmem:[#allocation2] sm:$0xff] %vm806_vm0, %v804_v1  ;;  %808 = vst.msk [vmem:[#allocation2 + $0x8] sm:$0xff] %vm806_vm0, %v805_v2 }
  0x23   : > { %v2508_v6 = vld [vmem:[%s3455_s22] ss:$0 sm:$0xff]  ;;  %v2509_v7 = vld [vmem:[%s3455_s22 + $0x1] ss:$0 sm:$0xff] }
  0x24   : > { %v820_v10 = vadd.f32 %v2508_v6, %v814_v9  ;;  %v828_v11 = vadd.f32 %v2509_v7, %v814_v9 }
  0x26   : > { %822 = vst.msk [vmem:[#allocation3] sm:$0xff] %vm821_vm2, %v820_v10  ;;  %830 = vst.msk [vmem:[#allocation3 + $0x8] sm:$0xff] %vm821_vm2, %v828_v11 }
  0x27 PF: > { %vm835_vm3 = vcmask 261120   ;;  %v2809_v26 = vld [vmem:[%s3054_s17] sm:$0xff]   ;;  %v2900_v27 = vmov 0.0   ;;  %v2810_v28 = vld [vmem:[%s3054_s17 + $0x8] sm:$0xff]   ;;  %vm2901_vm4 = vmmov 0   ;;  %s3456_s27 = sld [smem:[#allocation10_spill]]  ;;  %s3458_s15 = scalar_lea.vmem %s3420_s3, %s3036_s19 }
  0x28   : > { %2613 = vmatprep.subr.bf16.mxu0 %v2900_v27  ;;  %2633 = vmatprep.subr.bf16.mxu1 %v2900_v27  ;;  %v2511_v41 = vld [vmem:[%s3458_s15] ss:$0 sm:$0xff]  ;;  %s3459_s24 = scalar_lea.vmem %s3422_s5, %s3036_s19  ;;  %s2902_s17 = smov 88   ;;  %vm952_vm5 = vcmask 64512   ;;  %vm1018_vm6 = vcmask 1043456   ;;  %vm1411_vm7 = vcmask 130048  }
  0x29   : > { %2614 = vmatpush3.bf16.msra.mxu0 %v2809_v26  ;;  %2617 = vmatprep.mubr.msk.bf16.mxu0 %vm2901_vm4, %v2900_v27  ;;  %v2512_v46 = vld [vmem:[%s3459_s24] ss:$0 sm:$0xff]  ;;  %s2903_s23 = smov 96   ;;  %s2906_s20 = smov 80   ;;  %vm1413_vm8 = vcmask 195584  }
  0x2a   : > { %2615 = vmatprep.subr.bf16.mxu0 %v2900_v27  ;;  %2635 = vmatprep.mubr.msk.bf16.mxu1 %vm2901_vm4, %v2900_v27  ;;  %s2907_s30 = smov 104   ;;  %s2908_s15 = smov 72  }
  0x2b   : > { %s2909_s0 = smov 56   ;;  %s2910_s21 = smov 64  }
  0x2c   : > { %s2911_s24 = smov 48   ;;  %p2551_p6 = scmp.ne.s32.totalorder %s2889_s29, 1 }
  0x2d   : > { %2616 = vmatpush3.bf16.msra.mxu0 %v2810_v28  ;;  %s3457_s25 = scalar_lea.vmem %s3456_s27, %s3036_s19  ;;  %s2904_s27 = smov 120   ;;  %vm2266_vm9 = vcmask (!%p2551_p6), 1040384   ;;  %vm2276_vm10 = vcmask (!%p2551_p6), 254976   ;;  %vm2294_vm11 = vcmask (!%p2551_p6), 1024  }
  0x2e   : > { %v3105_v12 = vld [vmem:[#allocation2] sm:$0xff]  ;;  %v3107_v13 = vld [vmem:[#allocation2 + $0x8] sm:$0xff]  ;;  %2621 = vmatprep.subr.bf16.mxu0 %v2900_v27 }
  0x2f   : > { %v836_v14 = vsel %vm835_vm3, %v3105_v12, 0.0  ;;  %v839_v15 = vsel %vm835_vm3, %v3107_v13, 0.0  ;;  %v2510_v37 = vld [vmem:[%s3457_s25] ss:$0 sm:$0xff]  ;;  %s2905_s25 = smov 112  }
  0x30   : > { %837 = vadd.xlane.f32.xlu0 %v836_v14 }
  0x34   : > { %840 = vadd.xlane.f32.xlu0 %v839_v15 }
  0xbd   : > { %v838_v16 = vpop.xlane.xlu0 %837 }
  0xbe   : > { %v843_v17 = vmul.f32 0.03125, %v838_v16 }
  0xc0   : > { %v845_v18 = vsub.f32 %v3105_v12, %v843_v17  ;;  %v947_v17 = vld [vmem:[#allocation3] sm:$0xff] }
  0xc1   : > { %v841_v19 = vpop.xlane.xlu0 %840 }
  0xc2   : > { %v844_v20 = vmul.f32 0.03125, %v841_v19  ;;  %v847_v21 = vmul.f32 %v845_v18, %v845_v18 }
  0xc4   : > { %v846_v22 = vsub.f32 %v3107_v13, %v844_v20  ;;  %v849_v23 = vsel %vm835_vm3, %v847_v21, 0.0 }
  0xc5   : > { %850 = vadd.xlane.f32.xlu1 %v849_v23 }
  0xc6   : > { %v848_v24 = vmul.f32 %v846_v22, %v846_v22 }
  0xc8   : > { %v852_v25 = vsel %vm835_vm3, %v848_v24, 0.0 }
  0xc9   : > { %853 = vadd.xlane.f32.xlu1 %v852_v25 }
 0x152   : > { %v851_v29 = vpop.xlane.xlu1 %850 }
 0x153   : > { %v855_v30 = vmul.f32 0.03125, %v851_v29 }
 0x155   : > { %v857_v31 = vadd.f32 1e-05, %v855_v30 }
 0x156   : > { %v854_v32 = vpop.xlane.xlu1 %853 }
 0x157   : > { %2823 = vrsqrt.f32 %v857_v31  ;;  %v856_v33 = vmul.f32 0.03125, %v854_v32 }
 0x159   : > { %v858_v34 = vadd.f32 1e-05, %v856_v33 }
 0x15b   : > { %2825 = vrsqrt.f32 %v858_v34 }
 0x161   : > { %v2824_v35 = vpop.eup %2823 }
 0x162   : > { %v861_v36 = vmul.f32 %v2824_v35, %v845_v18 }
 0x164   : > { %v869_v40 = vmul.f32 %v2510_v37, %v861_v36 }
 0x165   : > { %v2826_v38 = vpop.eup %2825 }
 0x166   : > { %v862_v39 = vmul.f32 %v2826_v38, %v846_v22  ;;  %v877_v43 = vadd.f32 %v2511_v41, %v869_v40 }
 0x168   : > { %v870_v42 = vmul.f32 %v2510_v37, %v862_v39 }
 0x16a   : > { %v878_v44 = vadd.f32 %v2511_v41, %v870_v42 }
 0x16c   : > { %v879_v45 = vpack.c.bf16 %v878_v44, %v877_v43 }
 0x16e   : > { %2618 = vmatmul.mubr.msk.bf16.vlgmr.msra.gmra.mrb[0].mxu0 %vm835_vm3, %v879_v45 }
 0x16f   : > { %2623 = vmatprep.mubr.msk.bf16.mxu0 %vm2901_vm4, %v2900_v27 }
 0x241   : > { %v940_v47 = vpop.f32.mrb[0].mxu0 }
 0x242   : > { %v941_v48 = vadd.f32 %v2512_v46, %v940_v47  ;;  %v2619_v49 = vpop.f32.mrb[1].mxu0  ;;  %v1416_v47 = vld [vmem:[#allocation3 + $0x8] sm:$0xff] }
 0x243   : > { %v943_v50 = vpop.f32.mrb[2].mxu0 }
 0x244   : > { %v3145_v51 = vpack.c.bf16 %v941_v48, %v941_v48  ;;  %v2620_v52 = vpop.f32.mrb[3].mxu0  ;;  %v944_v53 = vadd.f32 %v2512_v46, %v943_v50 }
 0x246   : > { %1064 = vrot.lane.b32.xlu1 %v3145_v51, %s2902_s17  ;;  %950 = vrot.lane.b32.xlu0 %v3145_v51, %s2903_s23  ;;  %v3153_v54 = vpack.c.bf16 %v944_v53, %v944_v53 }
 0x24a   : > { %1062 = vrot.lane.b32.xlu1 %v3145_v51, %s2904_s27  ;;  %1174 = vrot.lane.b32.xlu0 %v3145_v51, %s2905_s25 }
 0x24e   : > { %1176 = vrot.lane.b32.xlu1 %v3145_v51, %s2906_s20  ;;  %1286 = vrot.lane.b32.xlu0 %v3145_v51, %s2907_s30 }
 0x252   : > { %1288 = vrot.lane.b32.xlu1 %v3145_v51, %s2908_s15  ;;  %1531 = vrot.lane.b32.xlu0 %v3153_v54, %s2902_s17  ;;  %s2912_s17 = smov 40  }
 0x256   : > { %1643 = vrot.lane.b32.xlu0 %v3153_v54, %s2906_s20  ;;  %1419 = vrot.lane.b32.xlu1 %v3153_v54, %s2903_s23  ;;  %s2913_s23 = smov 8  }
 0x25a   : > { %1755 = vrot.lane.b32.xlu0 %v3153_v54, %s2908_s15  ;;  %1529 = vrot.lane.b32.xlu1 %v3153_v54, %s2904_s27  ;;  %s2914_s27 = smov 16  }
 0x25e   : > { %1641 = vrot.lane.b32.xlu1 %v3153_v54, %s2905_s25  ;;  %s2915_s25 = smov 24  }
 0x262   : > { %1753 = vrot.lane.b32.xlu1 %v3153_v54, %s2907_s30  ;;  %s3460_s30 = scalar_lea.vmem %s3424_s7, %s3036_s19 }
 0x266   : > { %1126 = vrot.lane.b32.xlu1 %v3145_v51, %s2909_s0 }
 0x2b8   : > { %v1065_v55 = vpop.permute.xlu1 %1064  ;;  %v951_v56 = vpop.permute.xlu0 %950 }
 0x2b9   : > { %v957_v57 = vsel %vm952_vm5, %v951_v56, 0  ;;  %v1070_v58 = vsel %vm952_vm5, %v1065_v55, 0 }
 0x2ba   : > { %2622 = vmatpush3.bf16.xpose.msra.mxu0 %v957_v57  ;;  %2634 = vmatpush3.bf16.xpose.msra.mxu1 %v1070_v58 }
 0x2bb   : > { %2645 = vmatprep.subr.bf16.mxu1 %v2900_v27  ;;  %2627 = vmatprep.subr.bf16.mxu0 %v2900_v27 }
 0x2bc   : > { %v1063_v59 = vpop.permute.xlu1 %1062  ;;  %v1175_v63 = vpop.permute.xlu0 %1174 }
 0x2c0   : > { %v1177_v60 = vpop.permute.xlu1 %1176  ;;  %v1287_v2 = vpop.permute.xlu0 %1286 }
 0x2c1   : > { %v1182_v61 = vsel %vm952_vm5, %v1177_v60, 0  ;;  %2624 = vmatmul.mubr.msk.bf16.vlgmr.msra.gmra.mrb[4].mxu0 %vm952_vm5, %v3145_v51  ;;  %2636 = vmatmul.mubr.msk.bf16.vlgmr.msra.gmra.mrb[0].mxu1 %vm952_vm5, %v1063_v59 }
 0x2c2   : > { %2646 = vmatpush3.bf16.xpose.msra.mxu1 %v1182_v61  ;;  %2647 = vmatprep.mubr.msk.bf16.mxu1 %vm2901_vm4, %v2900_v27 }
 0x2c3   : > { %2657 = vmatprep.subr.bf16.mxu1 %v2900_v27  ;;  %2629 = vmatprep.mubr.msk.bf16.mxu0 %vm2901_vm4, %v2900_v27 }
 0x2c4   : > { %v1289_v62 = vpop.permute.xlu1 %1288  ;;  %v1532_v4 = vpop.permute.xlu0 %1531 }
 0x2c5   : > { %v1294_v0 = vsel %vm952_vm5, %v1289_v62, 0  ;;  %v1537_v5 = vsel %vm952_vm5, %v1532_v4, 0 }
 0x2c8   : > { %v1420_v1 = vpop.permute.xlu1 %1419  ;;  %v1644_v6 = vpop.permute.xlu0 %1643 }
 0x2c9   : > { %2648 = vmatmul.mubr.msk.bf16.vlgmr.msra.gmra.mrb[4].mxu1 %vm952_vm5, %v1175_v63  ;;  %v1425_v3 = vsel %vm952_vm5, %v1420_v1, 0  ;;  %v1649_v8 = vsel %vm952_vm5, %v1644_v6, 0 }
 0x2ca   : > { %2658 = vmatpush3.bf16.xpose.msra.mxu1 %v1294_v0  ;;  %2659 = vmatprep.mubr.msk.bf16.mxu1 %vm2901_vm4, %v2900_v27 }
 0x2cb   : > { %2669 = vmatprep.subr.bf16.mxu1 %v2900_v27 }
 0x2cc   : > { %v1530_v7 = vpop.permute.xlu1 %1529  ;;  %v1756_v9 = vpop.permute.xlu0 %1755 }
 0x2cd   : > { %v1761_v11 = vsel %vm952_vm5, %v1756_v9, 0 }
 0x2d0   : > { %v1642_v10 = vpop.permute.xlu1 %1641 }
 0x2d1   : > { %2660 = vmatmul.mubr.msk.bf16.vlgmr.msra.gmra.mrb[8].mxu1 %vm952_vm5, %v1287_v2 }
 0x2d2   : > { %2670 = vmatpush3.bf16.xpose.msra.mxu1 %v1425_v3  ;;  %2671 = vmatprep.mubr.msk.bf16.mxu1 %vm2901_vm4, %v2900_v27 }
 0x2d3   : > { %2681 = vmatprep.subr.bf16.mxu1 %v2900_v27 }
 0x2d4   : > { %v1754_v14 = vpop.permute.xlu1 %1753 }
 0x2d9   : > { %2672 = vmatmul.mubr.msk.bf16.vlgmr.msra.gmra.mrb[12].mxu1 %vm952_vm5, %v3153_v54 }
 0x2da   : > { %2682 = vmatpush3.bf16.xpose.msra.mxu1 %v1537_v5  ;;  %2683 = vmatprep.mubr.msk.bf16.mxu1 %vm2901_vm4, %v2900_v27 }
 0x2db   : > { %2693 = vmatprep.subr.bf16.mxu1 %v2900_v27 }
 0x2e1   : > { %2684 = vmatmul.mubr.msk.bf16.vlgmr.msra.gmra.mrb[16].mxu1 %vm952_vm5, %v1530_v7 }
 0x2e2   : > { %2694 = vmatpush3.bf16.xpose.msra.mxu1 %v1649_v8  ;;  %2695 = vmatprep.mubr.msk.bf16.mxu1 %vm2901_vm4, %v2900_v27 }
 0x2e3   : > { %2705 = vmatprep.subr.bf16.mxu1 %v2900_v27 }
 0x2e9   : > { %2696 = vmatmul.mubr.msk.bf16.vlgmr.msra.gmra.mrb[20].mxu1 %vm952_vm5, %v1642_v10 }
 0x2ea   : > { %2706 = vmatpush3.bf16.xpose.msra.mxu1 %v1761_v11  ;;  %2707 = vmatprep.mubr.msk.bf16.mxu1 %vm2901_vm4, %v2900_v27 }
 0x2eb   : > { %2717 = vmatprep.subr.bf16.mxu1 %v2900_v27 }
 0x2f1   : > { %2708 = vmatmul.mubr.msk.bf16.vlgmr.msra.gmra.mrb[24].mxu1 %vm952_vm5, %v1754_v14  ;;  %v3231_v14 = vpop.permute.xlu1 %1126 }
 0x2f2   : > { %2721 = vmatprep.mubr.msk.bf16.mxu1 %vm2901_vm4, %v2900_v27 }
 0x394   : > { %v993_v15 = vpop.f32.mrb[4].mxu0  ;;  %v1106_v16 = vpop.f32.mrb[0].mxu1 }
 0x395   : > { %v999_v18 = vmul.f32 0.35355338, %v993_v15  ;;  %v1112_v19 = vmul.f32 0.35355338, %v1106_v16  ;;  %v2625_v20 = vpop.f32.mrb[5].mxu0  ;;  %v2637_v21 = vpop.f32.mrb[1].mxu1 }
 0x396   : > { %v996_v22 = vpop.f32.mrb[6].mxu0  ;;  %v1109_v23 = vpop.f32.mrb[2].mxu1 }
 0x397   : > { %v2626_v24 = vpop.f32.mrb[7].mxu0  ;;  %v2638_v25 = vpop.f32.mrb[3].mxu1  ;;  %v3207_v26 = vadd.f32 %v1112_v19, %v947_v17  ;;  %v3209_v28 = vadd.f32 %v999_v18, %v947_v17 }
 0x399   : > { %v1114_v29 = vsel %vm952_vm5, %v3207_v26, -inf  ;;  %v1001_v30 = vsel %vm952_vm5, %v3209_v28, -inf }
 0x39a   : > { %1115 = vmax.xlane.f32.xlu1 %v1114_v29  ;;  %1002 = vmax.xlane.f32.xlu0 %v1001_v30 }
 0x39c   : > { %v1218_v31 = vpop.f32.mrb[4].mxu1 }
 0x39d   : > { %v2649_v32 = vpop.f32.mrb[5].mxu1  ;;  %v1224_v60 = vmul.f32 0.35355338, %v1218_v31 }
 0x39e   : > { %v1221_v33 = vpop.f32.mrb[6].mxu1 }
 0x39f   : > { %v2650_v34 = vpop.f32.mrb[7].mxu1  ;;  %v1225_v2 = vadd.f32 %v1224_v60, %v947_v17 }
 0x3a1   : > { %v1226_v4 = vsel %vm952_vm5, %v1225_v2, -inf }
 0x3a4   : > { %v1330_v35 = vpop.f32.mrb[8].mxu1 }
 0x3a5   : > { %v2661_v36 = vpop.f32.mrb[9].mxu1  ;;  %v1336_v1 = vmul.f32 0.35355338, %v1330_v35 }
 0x3a6   : > { %v1333_v37 = vpop.f32.mrb[10].mxu1 }
 0x3a7   : > { %v2662_v38 = vpop.f32.mrb[11].mxu1  ;;  %v1337_v5 = vadd.f32 %v1336_v1, %v947_v17 }
 0x3a9   : > { %v1338_v7 = vsel %vm952_vm5, %v1337_v5, -inf }
 0x3ac   : > { %v1461_v39 = vpop.f32.mrb[12].mxu1 }
 0x3ad   : > { %v2673_v40 = vpop.f32.mrb[13].mxu1  ;;  %v1467_v3 = vmul.f32 0.35355338, %v1461_v39 }
 0x3ae   : > { %v1464_v41 = vpop.f32.mrb[14].mxu1 }
 0x3af   : > { %v2674_v42 = vpop.f32.mrb[15].mxu1  ;;  %v1468_v8 = vadd.f32 %v1467_v3, %v1416_v47 }
 0x3b0   : > { %1013 = vrot.lane.b32.xlu0 %v3145_v51, %s2910_s21 }
 0x3b1   : > { %v1469_v9 = vsel %vm952_vm5, %v1468_v8, -inf }
 0x3b4   : > { %v1573_v43 = vpop.f32.mrb[16].mxu1 }
 0x3b5   : > { %v1579_v44 = vmul.f32 0.35355338, %v1573_v43  ;;  %v2685_v45 = vpop.f32.mrb[17].mxu1 }
 0x3b6   : > { %v1576_v46 = vpop.f32.mrb[18].mxu1 }
 0x3b7   : > { %v2686_v48 = vpop.f32.mrb[19].mxu1  ;;  %v3217_v49 = vadd.f32 %v1579_v44, %v1416_v47 }
 0x3b9   : > { %v1581_v50 = vsel %vm952_vm5, %v3217_v49, -inf }
 0x3ba   : > { %1582 = vmax.xlane.f32.xlu1 %v1581_v50 }
 0x3bc   : > { %v1685_v52 = vpop.f32.mrb[20].mxu1 }
 0x3bd   : > { %v2697_v53 = vpop.f32.mrb[21].mxu1  ;;  %v1691_v6 = vmul.f32 0.35355338, %v1685_v52 }
 0x3be   : > { %v1688_v55 = vpop.f32.mrb[22].mxu1 }
 0x3bf   : > { %v2698_v56 = vpop.f32.mrb[23].mxu1  ;;  %v1692_v10 = vadd.f32 %v1691_v6, %v1416_v47 }
 0x3c1   : > { %v1693_v11 = vsel %vm952_vm5, %v1692_v10, -inf }
 0x3c4   : > { %v1797_v57 = vpop.f32.mrb[24].mxu1 }
 0x3c5   : > { %v1803_v58 = vmul.f32 0.35355338, %v1797_v57  ;;  %v2709_v59 = vpop.f32.mrb[25].mxu1 }
 0x3c6   : > { %v1800_v61 = vpop.f32.mrb[26].mxu1 }
 0x3c7   : > { %v2710_v62 = vpop.f32.mrb[27].mxu1  ;;  %v3221_v63 = vadd.f32 %v1803_v58, %v1416_v47 }
 0x3c9   : > { %v1805_v0 = vsel %vm952_vm5, %v3221_v63, -inf }
 0x3ca   : > { %1806 = vmax.xlane.f32.xlu1 %v1805_v0 }
 0x3cf   : > { %1227 = vmax.xlane.f32.xlu0 %v1226_v4 }
 0x3d3   : > { %1339 = vmax.xlane.f32.xlu0 %v1338_v7 }
 0x3d7   : > { %1470 = vmax.xlane.f32.xlu0 %v1469_v9 }
 0x3db   : > { %1694 = vmax.xlane.f32.xlu0 %v1693_v11 }
 0x3f1   : > { %1238 = vrot.lane.b32.xlu0 %v3145_v51, %s2911_s24 }
 0x427   : > { %v1116_v15 = vpop.xlane.xlu1 %1115  ;;  %v1003_v16 = vpop.xlane.xlu0 %1002 }
 0x428   : > { %v1117_v17 = vsub.f32 %v3207_v26, %v1116_v15  ;;  %v1004_v18 = vsub.f32 %v3209_v28, %v1003_v16 }
 0x42a   : > { %v1118_v19 = vmul.f32 1.442695, %v1117_v17  ;;  %v1005_v20 = vmul.f32 1.442695, %v1004_v18 }
 0x42b   : > { %v1014_v21 = vpop.permute.xlu0 %1013 }
 0x42c   : > { %2827 = vpow2.f32 %v1118_v19  ;;  %v1020_v22 = vsel %vm1018_vm6, %v1014_v21, 0 }
 0x42d   : > { %2829 = vpow2.f32 %v1005_v20  ;;  %2628 = vmatpush3.bf16.msra.mxu0 %v1020_v22 }
 0x42e   : > { %2639 = vmatprep.subr.bf16.mxu0 %v2900_v27 }
 0x436   : > { %v3237_v23 = vpop.eup %2827 }
 0x437   : > { %v2830_v24 = vpop.eup %2829  ;;  %v1120_v25 = vsel %vm952_vm5, %v3237_v23, 0.0 }
 0x438   : > { %1121 = vadd.xlane.f32.xlu1 %v1120_v25  ;;  %v1007_v26 = vsel %vm952_vm5, %v2830_v24, 0.0 }
 0x439   : > { %1008 = vadd.xlane.f32.xlu0 %v1007_v26 }
 0x447   : > { %v1583_v31 = vpop.xlane.xlu1 %1582 }
 0x448   : > { %v1584_v34 = vsub.f32 %v3217_v49, %v1583_v31 }
 0x449   : > { %1481 = vrot.lane.b32.xlu1 %v3153_v54, %s2910_s21 }
 0x44a   : > { %v1585_v38 = vmul.f32 1.442695, %v1584_v34 }
 0x457   : > { %v1807_v52 = vpop.xlane.xlu1 %1806 }
 0x458   : > { %v1808_v53 = vsub.f32 %v3221_v63, %v1807_v52 }
 0x45a   : > { %v1809_v55 = vmul.f32 1.442695, %v1808_v53 }
 0x45c   : > { %v1228_v28 = vpop.xlane.xlu0 %1227 }
 0x45d   : > { %v1229_v29 = vsub.f32 %v1225_v2, %v1228_v28  ;;  %v1132_v2 = vsel %vm1018_vm6, %v3231_v14, 0 }
 0x45f   : > { %v1230_v30 = vmul.f32 1.442695, %v1229_v29 }
 0x460   : > { %v1340_v32 = vpop.xlane.xlu0 %1339 }
 0x461   : > { %2831 = vpow2.f32 %v1230_v30  ;;  %v1341_v33 = vsub.f32 %v1337_v5, %v1340_v32 }
 0x463   : > { %v1342_v35 = vmul.f32 1.442695, %v1341_v33 }
 0x464   : > { %v1471_v36 = vpop.xlane.xlu0 %1470 }
 0x465   : > { %2833 = vpow2.f32 %v1342_v35  ;;  %v1472_v37 = vsub.f32 %v1468_v8, %v1471_v36 }
 0x467   : > { %v1473_v39 = vmul.f32 1.442695, %v1472_v37 }
 0x468   : > { %v1695_v48 = vpop.xlane.xlu0 %1694 }
 0x469   : > { %2835 = vpow2.f32 %v1473_v39  ;;  %v1696_v49 = vsub.f32 %v1692_v10, %v1695_v48 }
 0x46a   : > { %2837 = vpow2.f32 %v1585_v38 }
 0x46b   : > { %v2832_v40 = vpop.eup %2831  ;;  %v1697_v50 = vmul.f32 1.442695, %v1696_v49 }
 0x46c   : > { %v1232_v41 = vsel %vm952_vm5, %v2832_v40, 0.0  ;;  %v1239_v59 = vpop.permute.xlu0 %1238 }
 0x46d   : > { %1233 = vadd.xlane.f32.xlu0 %v1232_v41  ;;  %2839 = vpow2.f32 %v1697_v50  ;;  %v1244_v4 = vsel %vm1018_vm6, %v1239_v59, 0 }
 0x46e   : > { %2841 = vpow2.f32 %v1809_v55 }
 0x46f   : > { %v3246_v42 = vpop.eup %2833 }
 0x470   : > { %v1344_v43 = vsel %vm952_vm5, %v3246_v42, 0.0 }
 0x471   : > { %1345 = vadd.xlane.f32.xlu1 %v1344_v43 }
 0x473   : > { %v3250_v44 = vpop.eup %2835 }
 0x474   : > { %v1475_v45 = vsel %vm952_vm5, %v3250_v44, 0.0  ;;  %v3254_v46 = vpop.eup %2837 }
 0x475   : > { %1476 = vadd.xlane.f32.xlu1 %v1475_v45  ;;  %v1587_v47 = vsel %vm952_vm5, %v3254_v46, 0.0 }
 0x477   : > { %v3262_v56 = vpop.eup %2839 }
 0x478   : > { %v1699_v57 = vsel %vm952_vm5, %v3262_v56, 0.0  ;;  %v3266_v58 = vpop.eup %2841 }
 0x479   : > { %1588 = vadd.xlane.f32.xlu1 %v1587_v47 }
 0x483   : > { %1350 = vrot.lane.b32.xlu0 %v3145_v51, %s2912_s17  ;;  %v1811_v51 = vsel %vm952_vm5, %v3266_v58, 0.0 }
 0x48a   : > { %1593 = vrot.lane.b32.xlu1 %v3153_v54, %s2909_s0 }
 0x4a2   : > { %1700 = vadd.xlane.f32.xlu0 %v1699_v57 }
 0x4ae   : > { %1812 = vadd.xlane.f32.xlu1 %v1811_v51 }
 0x4b8   : > { %1705 = vrot.lane.b32.xlu0 %v3153_v54, %s2911_s24 }
 0x4bf   : > { %1817 = vrot.lane.b32.xlu1 %v3153_v54, %s2912_s17  ;;  %s3461_s17 = sld [smem:[#allocation13_spill]] (!%p2551_p6) }
 0x4c5   : > { %v1122_v61 = vpop.xlane.xlu1 %1121 }
 0x4c6   : > { %v1009_v60 = vpop.xlane.xlu0 %1008 }
 0x4c7   : > { %2843 = vrcp.f32 %v1009_v60 }
 0x4c8   : > { %2845 = vrcp.f32 %v1122_v61 }
 0x4c9   : > { %v1482_v5 = vpop.permute.xlu1 %1481 }
 0x4ca   : > { %v1487_v21 = vsel %vm1018_vm6, %v1482_v5, 0 }
 0x4d1   : > { %v2844_v62 = vpop.eup %2843 }
 0x4d2   : > { %v1011_v63 = vmul.f32 %v2844_v62, %v2830_v24  ;;  %v2846_v1 = vpop.eup %2845 }
 0x4d3   : > { %v1124_v54 = vmul.f32 %v2846_v1, %v3237_v23 }
 0x4d4   : > { %v1012_v0 = vpack.c.bf16 %v1011_v63, %v1011_v63 }
 0x4d5   : > { %v1125_v3 = vpack.c.bf16 %v1124_v54, %v1124_v54 }
 0x4d6   : > { %2630 = vmatmul.mubr.msk.bf16.vlgmr.msra.gmra.mrb[8].mxu0 %vm952_vm5, %v1012_v0 }
 0x4d7   : > { %2640 = vmatpush3.bf16.msra.mxu0 %v1132_v2  ;;  %2641 = vmatprep.mubr.msk.bf16.mxu0 %vm2901_vm4, %v2900_v27 }
 0x4d8   : > { %2651 = vmatprep.subr.bf16.mxu0 %v2900_v27 }
 0x4de   : > { %2642 = vmatmul.mubr.msk.bf16.vlgmr.msra.gmra.mrb[12].mxu0 %vm952_vm5, %v1125_v3  ;;  %v2811_v3 = vld [vmem:[%s3059_s18] sm:$0xff]  }
 0x4df   : > { %2652 = vmatpush3.bf16.msra.mxu0 %v1244_v4  ;;  %2653 = vmatprep.mubr.msk.bf16.mxu0 %vm2901_vm4, %v2900_v27 }
 0x4e0   : > { %2663 = vmatprep.subr.bf16.mxu0 %v2900_v27  ;;  %2718 = vmatpush3.bf16.msra.mxu1 %v2811_v3  ;;  %v2537_v3 = vld [vmem:[%s778_s28] ss:$0 sm:$0xff] }
 0x4e1   : > { %2719 = vmatprep.subr.bf16.mxu1 %v2900_v27 }
 0x4fa   : > { %v1234_v6 = vpop.xlane.xlu0 %1233 }
 0x4fb   : > { %2847 = vrcp.f32 %v1234_v6 }
 0x4fe   : > { %v1346_v7 = vpop.xlane.xlu1 %1345  ;;  %v1351_v11 = vpop.permute.xlu0 %1350 }
 0x4ff   : > { %2849 = vrcp.f32 %v1346_v7  ;;  %v1356_v16 = vsel %vm1018_vm6, %v1351_v11, 0 }
 0x502   : > { %v1477_v8 = vpop.xlane.xlu1 %1476 }
 0x503   : > { %2851 = vrcp.f32 %v1477_v8 }
 0x505   : > { %v2848_v9 = vpop.eup %2847 }
 0x506   : > { %v1236_v10 = vmul.f32 %v2848_v9, %v2832_v40  ;;  %v1589_v18 = vpop.xlane.xlu1 %1588  ;;  %v2812_v9 = vld [vmem:[%s3059_s18 + $0x8] sm:$0xff]  }
 0x507   : > { %2853 = vrcp.f32 %v1589_v18  ;;  %2720 = vmatpush3.bf16.msra.mxu1 %v2812_v9  ;;  %v2816_v9 = vld [vmem:[%s3086_s2 + $0x8] sm:$0xff]  }
 0x508   : > { %v1237_v14 = vpack.c.bf16 %v1236_v10, %v1236_v10  ;;  %2733 = vmatprep.subr.bf16.mxu1 %v2900_v27 }
 0x509   : > { %v2850_v15 = vpop.eup %2849 }
 0x50a   : > { %2654 = vmatmul.mubr.msk.bf16.vlgmr.msra.gmra.mrb[16].mxu0 %vm952_vm5, %v1237_v14  ;;  %v1348_v17 = vmul.f32 %v2850_v15, %v3246_v42  ;;  %v1594_v23 = vpop.permute.xlu1 %1593 }
 0x50b   : > { %2664 = vmatpush3.bf16.msra.mxu0 %v1356_v16  ;;  %2665 = vmatprep.mubr.msk.bf16.mxu0 %vm2901_vm4, %v2900_v27  ;;  %v1599_v26 = vsel %vm1018_vm6, %v1594_v23, 0 }
 0x50c   : > { %2675 = vmatprep.subr.bf16.mxu0 %v2900_v27  ;;  %v1349_v19 = vpack.c.bf16 %v1348_v17, %v1348_v17 }
 0x50d   : > { %v2852_v20 = vpop.eup %2851 }
 0x50e   : > { %v1479_v22 = vmul.f32 %v2852_v20, %v3250_v44 }
 0x510   : > { %v1480_v24 = vpack.c.bf16 %v1479_v22, %v1479_v22 }
 0x511   : > { %v2854_v25 = vpop.eup %2853 }
 0x512   : > { %2666 = vmatmul.mubr.msk.bf16.vlgmr.msra.gmra.mrb[20].mxu0 %vm952_vm5, %v1349_v19  ;;  %v1591_v28 = vmul.f32 %v2854_v25, %v3254_v46 }
 0x513   : > { %2676 = vmatpush3.bf16.msra.mxu0 %v1487_v21  ;;  %2677 = vmatprep.mubr.msk.bf16.mxu0 %vm2901_vm4, %v2900_v27 }
 0x514   : > { %2687 = vmatprep.subr.bf16.mxu0 %v2900_v27  ;;  %v1592_v29 = vpack.c.bf16 %v1591_v28, %v1591_v28 }
 0x51a   : > { %2678 = vmatmul.mubr.msk.bf16.vlgmr.msra.gmra.mrb[24].mxu0 %vm952_vm5, %v1480_v24 }
 0x51b   : > { %2688 = vmatpush3.bf16.msra.mxu0 %v1599_v26  ;;  %2689 = vmatprep.mubr.msk.bf16.mxu0 %vm2901_vm4, %v2900_v27 }
 0x51c   : > { %2699 = vmatprep.subr.bf16.mxu0 %v2900_v27 }
 0x522   : > { %2690 = vmatmul.mubr.msk.bf16.vlgmr.msra.gmra.mrb[28].mxu0 %vm952_vm5, %v1592_v29 }
 0x523   : > { %2701 = vmatprep.mubr.msk.bf16.mxu0 %vm2901_vm4, %v2900_v27 }
 0x52f   : > { %v1701_v30 = vpop.xlane.xlu0 %1700 }
 0x530   : > { %2855 = vrcp.f32 %v1701_v30 }
 0x533   : > { %v1706_v31 = vpop.permute.xlu0 %1705 }
 0x534   : > { %v1711_v32 = vsel %vm1018_vm6, %v1706_v31, 0 }
 0x535   : > { %2700 = vmatpush3.bf16.msra.mxu0 %v1711_v32 }
 0x536   : > { %2711 = vmatprep.subr.bf16.mxu0 %v2900_v27 }
 0x53a   : > { %v2856_v33 = vpop.eup %2855 }
 0x53b   : > { %v1703_v34 = vmul.f32 %v2856_v33, %v3262_v56  ;;  %v1813_v35 = vpop.xlane.xlu1 %1812 }
 0x53c   : > { %2857 = vrcp.f32 %v1813_v35  ;;  %v2535_v35 = vld [vmem:[%s3460_s30] ss:$0 sm:$0xff]  ;;  %s3463_s30 = sld [smem:[#allocation15_spill]] (!%p2551_p6) }
 0x53d   : > { %v1704_v36 = vpack.c.bf16 %v1703_v34, %v1703_v34 }
 0x53f   : > { %v1818_v37 = vpop.permute.xlu1 %1817  ;;  %2702 = vmatmul.mubr.msk.bf16.vlgmr.msra.gmra.mrb[32].mxu0 %vm952_vm5, %v1704_v36 }
 0x540   : > { %v1823_v38 = vsel %vm1018_vm6, %v1818_v37, 0  ;;  %2713 = vmatprep.mubr.msk.bf16.mxu0 %vm2901_vm4, %v2900_v27 }
 0x541   : > { %2712 = vmatpush3.bf16.msra.mxu0 %v1823_v38 }
 0x542   : > { %2725 = vmatprep.subr.bf16.mxu0 %v2900_v27 }
 0x546   : > { %v2858_v39 = vpop.eup %2857 }
 0x547   : > { %v1815_v40 = vmul.f32 %v2858_v39, %v3266_v58 }
 0x549   : > { %v1816_v41 = vpack.c.bf16 %v1815_v40, %v1815_v40 }
 0x54b   : > { %2714 = vmatmul.mubr.msk.bf16.vlgmr.msra.gmra.mrb[36].mxu0 %vm952_vm5, %v1816_v41 }
 0x54c   : > { %2729 = vmatprep.mubr.msk.bf16.mxu0 %vm2901_vm4, %v2900_v27 }
 0x5a9   : > { %v1056_v42 = vpop.f32.mrb[8].mxu0 }
 0x5aa   : > { %v2631_v43 = vpop.f32.mrb[9].mxu0 }
 0x5ab   : > { %v1059_v44 = vpop.f32.mrb[10].mxu0 }
 0x5ac   : > { %v2632_v45 = vpop.f32.mrb[11].mxu0 }
 0x5b1   : > { %v1168_v46 = vpop.f32.mrb[12].mxu0 }
 0x5b2   : > { %v2643_v47 = vpop.f32.mrb[13].mxu0 }
 0x5b3   : > { %v1171_v48 = vpop.f32.mrb[14].mxu0 }
 0x5b4   : > { %v2644_v49 = vpop.f32.mrb[15].mxu0 }
 0x5dd   : > { %v1280_v50 = vpop.f32.mrb[16].mxu0 }
 0x5de   : > { %v2655_v52 = vpop.f32.mrb[17].mxu0 }
 0x5df   : > { %v1283_v53 = vpop.f32.mrb[18].mxu0 }
 0x5e0   : > { %v2656_v55 = vpop.f32.mrb[19].mxu0 }
 0x5e1   : > { %v2813_v55 = vld [vmem:[%s3076_s4] sm:$0xff]  }
 0x5e2   : > { %2726 = vmatpush3.bf16.msra.mxu0 %v2813_v55 }
 0x5e3   : > { %2727 = vmatprep.subr.bf16.mxu0 %v2900_v27 }
 0x5e5   : > { %v1392_v56 = vpop.f32.mrb[20].mxu0 }
 0x5e6   : > { %v2667_v57 = vpop.f32.mrb[21].mxu0 }
 0x5e7   : > { %v1395_v58 = vpop.f32.mrb[22].mxu0 }
 0x5e8   : > { %v2668_v51 = vpop.f32.mrb[23].mxu0 }
 0x5ed   : > { %v1523_v59 = vpop.f32.mrb[24].mxu0 }
 0x5ee   : > { %v2679_v60 = vpop.f32.mrb[25].mxu0 }
 0x5ef   : > { %v1526_v61 = vpop.f32.mrb[26].mxu0 }
 0x5f0   : > { %v2680_v62 = vpop.f32.mrb[27].mxu0 }
 0x5f5   : > { %v1635_v63 = vpop.f32.mrb[28].mxu0 }
 0x5f6   : > { %v2794_v0 = vpack.i.bf16 %v1635_v63, %v1168_v46  ;;  %v2691_v1 = vpop.f32.mrb[29].mxu0 }
 0x5f7   : > { %v1638_v2 = vpop.f32.mrb[30].mxu0 }
 0x5f8   : > { %2795 = vrot.lane.b32.xlu0 %v2794_v0, %s2913_s23  ;;  %v2692_v54 = vpop.f32.mrb[31].mxu0  ;;  %v2536_v0 = vld [vmem:[%s775_s16] ss:$0 sm:$0xff] }
 0x612   : > { %v1747_v4 = vpop.f32.mrb[32].mxu0 }
 0x613   : > { %v2799_v5 = vpack.i.bf16 %v1747_v4, %v1280_v50  ;;  %v2703_v6 = vpop.f32.mrb[33].mxu0 }
 0x614   : > { %v1750_v7 = vpop.f32.mrb[34].mxu0 }
 0x615   : > { %2800 = vrot.lane.b32.xlu1 %v2799_v5, %s2914_s27  ;;  %v2704_v8 = vpop.f32.mrb[35].mxu0 }
 0x616   : > { %v2815_v8 = vld [vmem:[%s3086_s2] sm:$0xff]  }
 0x61e   : > { %v1859_v10 = vpop.f32.mrb[36].mxu0 }
 0x61f   : > { %v2804_v11 = vpack.i.bf16 %v1859_v10, %v1392_v56  ;;  %v2715_v14 = vpop.f32.mrb[37].mxu0  ;;  %v2814_v56 = vld [vmem:[%s3076_s4 + $0x8] sm:$0xff]   ;;  %v2817_v10 = vld [vmem:[%s3086_s2 + $0x10] sm:$0xff]  }
 0x620   : > { %v1862_v15 = vpop.f32.mrb[38].mxu0  ;;  %2728 = vmatpush3.bf16.msra.mxu0 %v2814_v56  ;;  %v2819_v14 = vld [vmem:[%s3086_s2 + $0x20] sm:$0xff]  }
 0x621   : > { %2805 = vrot.lane.b32.xlu0 %v2804_v11, %s2915_s25  ;;  %v2716_v16 = vpop.f32.mrb[39].mxu0  ;;  %v2818_v11 = vld [vmem:[%s3086_s2 + $0x18] sm:$0xff]   ;;  %v2820_v15 = vld [vmem:[%s3086_s2 + $0x28] sm:$0xff]   ;;  %s3462_s25 = sld [smem:[#allocation14_spill]] (!%p2551_p6) }
 0x622   : > { %v2821_v16 = vld [vmem:[%s3086_s2 + $0x30] sm:$0xff]  }
 0x66a   : > { %v2796_v17 = vpop.permute.xlu0 %2795 }
 0x66b   : > { %v2798_v19 = vunpack.i.h.bf16 %v2796_v17  ;;  %v2797_v20 = vunpack.i.l.bf16 %v2796_v17  ;;  %v2822_v17 = vld [vmem:[%s3086_s2 + $0x38] sm:$0xff]  }
 0x66d   : > { %v1877_v24 = vsel %vm952_vm5, %v1523_v59, %v2798_v19  ;;  %v1410_v25 = vsel %vm952_vm5, %v1056_v42, %v2797_v20 }
 0x687   : > { %v2801_v18 = vpop.permute.xlu1 %2800 }
 0x688   : > { %v2803_v21 = vunpack.i.h.bf16 %v2801_v18  ;;  %v2802_v22 = vunpack.i.l.bf16 %v2801_v18  ;;  %v2538_v18 = vld [vmem:[%s786_s6] ss:$0 sm:$0xff] }
 0x68a   : > { %v1878_v29 = vsel %vm1411_vm7, %v1877_v24, %v2803_v21  ;;  %v1412_v30 = vsel %vm1411_vm7, %v1410_v25, %v2802_v22 }
 0x693   : > { %v2806_v23 = vpop.permute.xlu0 %2805 }
 0x694   : > { %v2808_v26 = vunpack.i.h.bf16 %v2806_v23  ;;  %v2807_v28 = vunpack.i.l.bf16 %v2806_v23 }
 0x696   : > { %v1879_v31 = vsel %vm1413_vm8, %v1878_v29, %v2808_v26  ;;  %v1414_v32 = vsel %vm1413_vm8, %v1412_v30, %v2807_v28 }
 0x697   : > { %v1880_v33 = vpack.c.bf16 %v1879_v31, %v1414_v32 }
 0x699   : > { %2722 = vmatmul.mubr.msk.bf16.vlgmr.msra.gmra.mrb[28].mxu1 %vm835_vm3, %v1880_v33 }
 0x69a   : > { %2749 = vmatprep.mubr.msk.bf16.mxu1 %vm2901_vm4, %v2900_v27  ;;  %2734 = vmatpush3.bf16.msra.mxu1 %v2815_v8  ;;  %v2553_v8 = vld [vmem:[%s3461_s17] ss:$0 sm:$0xff] (!%p2551_p6) }
 0x69b   : > { %2735 = vmatprep.subr.bf16.mxu1 %v2900_v27 }
 0x69e   : > { %2736 = vmatpush3.bf16.msra.mxu1 %v2816_v9 }
 0x69f   : > { %2737 = vmatprep.subr.bf16.mxu1 %v2900_v27 }
 0x6a2   : > { %2738 = vmatpush3.bf16.msra.mxu1 %v2817_v10 }
 0x6a3   : > { %2739 = vmatprep.subr.bf16.mxu1 %v2900_v27 }
 0x6a6   : > { %2740 = vmatpush3.bf16.msra.mxu1 %v2818_v11 }
 0x6a7   : > { %2741 = vmatprep.subr.bf16.mxu1 %v2900_v27 }
 0x6aa   : > { %2742 = vmatpush3.bf16.msra.mxu1 %v2819_v14 }
 0x6ab   : > { %2743 = vmatprep.subr.bf16.mxu1 %v2900_v27 }
 0x6ae   : > { %2744 = vmatpush3.bf16.msra.mxu1 %v2820_v15 }
 0x6af   : > { %2745 = vmatprep.subr.bf16.mxu1 %v2900_v27 }
 0x6b2   : > { %2746 = vmatpush3.bf16.msra.mxu1 %v2821_v16 }
 0x6b3   : > { %2747 = vmatprep.subr.bf16.mxu1 %v2900_v27 }
 0x6b6   : > { %2748 = vmatpush3.bf16.msra.mxu1 %v2822_v17 }
 0x76c   : > { %v1934_v34 = vpop.f32.mrb[28].mxu1 }
 0x76d   : > { %v1941_v36 = vadd.f32 %v1934_v34, %v3105_v12  ;;  %v2723_v37 = vpop.f32.mrb[29].mxu1 }
 0x76e   : > { %v1937_v38 = vpop.f32.mrb[30].mxu1 }
 0x76f   : > { %v3333_v39 = vadd.f32 %v2535_v35, %v1941_v36  ;;  %v1942_v40 = vadd.f32 %v1937_v38, %v3107_v13  ;;  %v2724_v41 = vpop.f32.mrb[31].mxu1 }
 0x771   : > { %v3336_v42 = vadd.f32 %v2535_v35, %v1942_v40  ;;  %v1954_v43 = vsel %vm835_vm3, %v3333_v39, 0.0 }
 0x772   : > { %1955 = vadd.xlane.f32.xlu1 %v1954_v43 }
 0x773   : > { %v1957_v44 = vsel %vm835_vm3, %v3336_v42, 0.0 }
 0x774   : > { %1958 = vadd.xlane.f32.xlu0 %v1957_v44 }
 0x7ff   : > { %v1956_v12 = vpop.xlane.xlu1 %1955 }
 0x800   : > { %v1960_v45 = vmul.f32 0.03125, %v1956_v12 }
 0x801   : > { %v1959_v46 = vpop.xlane.xlu0 %1958 }
 0x802   : > { %v1962_v47 = vsub.f32 %v3333_v39, %v1960_v45  ;;  %v1961_v48 = vmul.f32 0.03125, %v1959_v46  ;;  %v2550_v46 = vld [vmem:[%s794_s26] ss:$0 sm:$0xff] }
 0x804   : > { %v1963_v13 = vsub.f32 %v3336_v42, %v1961_v48  ;;  %v1964_v49 = vmul.f32 %v1962_v47, %v1962_v47 }
 0x806   : > { %v1966_v50 = vsel %vm835_vm3, %v1964_v49, 0.0  ;;  %v1965_v52 = vmul.f32 %v1963_v13, %v1963_v13 }
 0x807   : > { %1967 = vadd.xlane.f32.xlu0 %v1966_v50 }
 0x808   : > { %v1969_v53 = vsel %vm835_vm3, %v1965_v52, 0.0 }
 0x80b   : > { %1970 = vadd.xlane.f32.xlu0 %v1969_v53 }
 0x894   : > { %v1968_v57 = vpop.xlane.xlu0 %1967 }
 0x895   : > { %v1972_v58 = vmul.f32 0.03125, %v1968_v57 }
 0x897   : > { %v1974_v51 = vadd.f32 1e-05, %v1972_v58 }
 0x898   : > { %v1971_v59 = vpop.xlane.xlu0 %1970 }
 0x899   : > { %2859 = vrsqrt.f32 %v1974_v51  ;;  %v1973_v60 = vmul.f32 0.03125, %v1971_v59 }
 0x89b   : > { %v1975_v61 = vadd.f32 1e-05, %v1973_v60 }
 0x89d   : > { %2861 = vrsqrt.f32 %v1975_v61 }
 0x8a3   : > { %v2860_v62 = vpop.eup %2859 }
 0x8a4   : > { %v1978_v63 = vmul.f32 %v2860_v62, %v1962_v47 }
 0x8a6   : > { %v1986_v2 = vmul.f32 %v2536_v0, %v1978_v63 }
 0x8a7   : > { %v2862_v1 = vpop.eup %2861 }
 0x8a8   : > { %v1979_v54 = vmul.f32 %v2862_v1, %v1963_v13  ;;  %v1994_v5 = vadd.f32 %v2537_v3, %v1986_v2 }
 0x8aa   : > { %v1987_v4 = vmul.f32 %v2536_v0, %v1979_v54 }
 0x8ac   : > { %v1995_v6 = vadd.f32 %v2537_v3, %v1987_v4 }
 0x8ae   : > { %v1996_v7 = vpack.c.bf16 %v1995_v6, %v1994_v5  ;;  %v2552_v6 = vld [vmem:[%s3431_s14] ss:$0 sm:$0xff] (!%p2551_p6) }
 0x8b0   : > { %2730 = vmatmul.mubr.msk.bf16.vlgmr.msra.gmra.mrb[40].mxu0 %vm835_vm3, %v1996_v7 }
 0x983   : > { %v2057_v19 = vpop.f32.mrb[40].mxu0 }
 0x984   : > { %v2058_v20 = vadd.f32 %v2538_v18, %v2057_v19  ;;  %v2731_v21 = vpop.f32.mrb[41].mxu0 }
 0x985   : > { %v2060_v22 = vpop.f32.mrb[42].mxu0 }
 0x986   : > { %v2066_v23 = vmul.f32 0.044715, %v2058_v20  ;;  %v2061_v24 = vadd.f32 %v2538_v18, %v2060_v22  ;;  %v2732_v25 = vpop.f32.mrb[43].mxu0  ;;  %v2064_v38 = vmul.f32 0.5, %v2058_v20 }
 0x988   : > { %v2068_v26 = vmul.f32 %v2066_v23, %v2058_v20  ;;  %v2067_v28 = vmul.f32 0.044715, %v2061_v24  ;;  %v2065_v40 = vmul.f32 0.5, %v2061_v24 }
 0x98a   : > { %v2070_v29 = vmul.f32 %v2068_v26, %v2058_v20  ;;  %v2069_v30 = vmul.f32 %v2067_v28, %v2061_v24 }
 0x98c   : > { %v2072_v31 = vadd.f32 %v2070_v29, %v2058_v20  ;;  %v2071_v32 = vmul.f32 %v2069_v30, %v2061_v24 }
 0x98e   : > { %v2074_v27 = vmul.f32 0.7978846, %v2072_v31  ;;  %v2073_v33 = vadd.f32 %v2071_v32, %v2061_v24 }
 0x990   : > { %2863 = vtanh.f32 %v2074_v27  ;;  %v2075_v34 = vmul.f32 0.7978846, %v2073_v33  ;;  %v2554_v33 = vld [vmem:[%s3462_s25] ss:$0 sm:$0xff] (!%p2551_p6) }
 0x992   : > { %2865 = vtanh.f32 %v2075_v34 }
 0x99a   : > { %v2864_v35 = vpop.eup %2863 }
 0x99b   : > { %v2078_v36 = vadd.f32 1.0, %v2864_v35 }
 0x99c   : > { %v2866_v37 = vpop.eup %2865 }
 0x99d   : > { %v2079_v41 = vadd.f32 1.0, %v2866_v37  ;;  %v2080_v43 = vmul.f32 %v2078_v36, %v2064_v38  ;;  %v2555_v37 = vld [vmem:[#allocation4] ss:$0 sm:$0xff] (!%p2551_p6) }
 0x99f   : > { %v2081_v44 = vmul.f32 %v2079_v41, %v2065_v40 }
 0x9a1   : > { %v2082_v12 = vpack.c.bf16 %v2081_v44, %v2080_v43 }
 0x9a3   : > { %2750 = vmatmul.mubr.bf16.vlgmr.msra.gmra.mrb[32].mxu1 %v2082_v12 }
 0xa76   : > { %v2181_v45 = vpop.f32.mrb[32].mxu1 }
 0xa77   : > { %v2188_v47 = vadd.f32 %v2181_v45, %v3333_v39  ;;  %v2751_v48 = vpop.f32.mrb[33].mxu1  ;;  %2204 = sbr.rel (%p2551_p6) target bundleno = 3192 (0xc78), region = 100 }
 0xa78   : > { %v2184_v13 = vpop.f32.mrb[34].mxu1 }
 0xa79   : > { %v2197_v49 = vadd.f32 %v2550_v46, %v2188_v47  ;;  %v2189_v50 = vadd.f32 %v2184_v13, %v3336_v42  ;;  %v2752_v52 = vpop.f32.mrb[35].mxu1 }
 0xa7b   : > { %2199 = vst.msk [vmem:[#allocation2] sm:$0xff] %vm835_vm3, %v2197_v49  ;;  %v2198_v53 = vadd.f32 %v2550_v46, %v2189_v50  ;;  %v2207_v55 = vsel (!%p2551_p6), %vm835_vm3, %v2197_v49, 0.0 }
 0xa7c   : > { %2208 = vadd.xlane.f32.xlu0 (!%p2551_p6), %v2207_v55 }
 0xa7d   : > { %2200 = vst.msk [vmem:[#allocation2 + $0x8] sm:$0xff] %vm835_vm3, %v2198_v53  ;;  %v2210_v56 = vsel (!%p2551_p6), %vm835_vm3, %v2198_v53, 0.0 }
 0xa80   : > { %2211 = vadd.xlane.f32.xlu0 %v2210_v56 }
 0xb09   : > { %v2209_v39 = vpop.xlane.xlu0 %2208 }
 0xb0a   : > { %v2213_v57 = vmul.f32 0.03125, %v2209_v39 }
 0xb0c   : > { %v2215_v58 = vsub.f32 %v2197_v49, %v2213_v57 }
 0xb0d   : > { %v2212_v51 = vpop.xlane.xlu0 %2211 }
 0xb0e   : > { %v2214_v42 = vmul.f32 0.03125, %v2212_v51  ;;  %v2217_v59 = vmul.f32 %v2215_v58, %v2215_v58 }
 0xb10   : > { %v2216_v60 = vsub.f32 %v2198_v53, %v2214_v42  ;;  %v2219_v61 = vsel %vm835_vm3, %v2217_v59, 0.0 }
 0xb11   : > { %2220 = vadd.xlane.f32.xlu1 %v2219_v61 }
 0xb12   : > { %v2218_v62 = vmul.f32 %v2216_v60, %v2216_v60 }
 0xb14   : > { %v2222_v63 = vsel %vm835_vm3, %v2218_v62, 0.0 }
 0xb15   : > { %2223 = vadd.xlane.f32.xlu1 %v2222_v63 }
 0xb9e   : > { %v2221_v0 = vpop.xlane.xlu1 %2220 }
 0xb9f   : > { %v2225_v1 = vmul.f32 0.03125, %v2221_v0 }
 0xba1   : > { %v2227_v2 = vadd.f32 1e-05, %v2225_v1 }
 0xba2   : > { %v2224_v54 = vpop.xlane.xlu1 %2223 }
 0xba3   : > { %2867 = vrsqrt.f32 %v2227_v2  ;;  %v2226_v3 = vmul.f32 0.03125, %v2224_v54 }
 0xba5   : > { %v2228_v4 = vadd.f32 1e-05, %v2226_v3 }
 0xba7   : > { %2869 = vrsqrt.f32 %v2228_v4 }
 0xbad   : > { %v2868_v5 = vpop.eup %2867 }
 0xbae   : > { %v2231_v7 = vmul.f32 %v2868_v5, %v2215_v58 }
 0xbb0   : > { %v2239_v9 = vmul.f32 %v2552_v6, %v2231_v7 }
 0xbb1   : > { %v2870_v10 = vpop.eup %2869 }
 0xbb2   : > { %v2232_v11 = vmul.f32 %v2870_v10, %v2216_v60  ;;  %v2247_v14 = vadd.f32 %v2553_v8, %v2239_v9 }
 0xbb4   : > { %v2240_v15 = vmul.f32 %v2552_v6, %v2232_v11  ;;  %v2249_v16 = vsel %vm835_vm3, %v2247_v14, 0.0 }
 0xbb5   : > { %v2250_v17 = vrot.slane %v2249_v16, 4 }
 0xbb6   : > { %v2248_v18 = vadd.f32 %v2553_v8, %v2240_v15 }
 0xbb7   : > { %v2251_v19 = vadd.f32 %v2250_v17, %v2249_v16 }
 0xbb8   : > { %v2258_v20 = vsel %vm835_vm3, %v2248_v18, 0.0 }
 0xbb9   : > { %v2252_v21 = vrot.slane %v2251_v19, 2  ;;  %v2259_v22 = vrot.slane %v2258_v20, 4 }
 0xbbb   : > { %v2253_v23 = vadd.f32 %v2252_v21, %v2251_v19  ;;  %v2260_v24 = vadd.f32 %v2259_v22, %v2258_v20 }
 0xbbd   : > { %v2254_v25 = vrot.slane %v2253_v23, 1  ;;  %v2261_v26 = vrot.slane %v2260_v24, 2 }
 0xbbf   : > { %v2262_v28 = vadd.f32 %v2261_v26, %v2260_v24  ;;  %v2255_v29 = vadd.f32 %v2254_v25, %v2253_v23 }
 0xbc1   : > { %v2263_v30 = vrot.slane %v2262_v28, 1  ;;  %v2257_v32 = vmul.f32 0.125, %v2255_v29 }
 0xbc3   : > { %v2264_v31 = vadd.f32 %v2263_v30, %v2262_v28 }
 0xbc5   : > { %v2265_v27 = vmul.f32 0.125, %v2264_v31 }
 0xbc7   : > { %v2267_v34 = vsel %vm2266_vm9, %v2257_v32, %v2265_v27 }
 0xbc8   : > { %v2275_v35 = vmul.f32 %v2554_v33, %v2267_v34 }
 0xbca   : > { %v2277_v36 = vsel %vm2276_vm10, %v2275_v35, 0.0 }
 0xbcb   : > { %2278 = vadd.xlane.f32.xlu0 %v2277_v36 }
 0xc58   : > { %v2279_v38 = vpop.xlane.xlu0 %2278 }
 0xc59   : > { %v2287_v40 = vadd.f32 %v2555_v37, %v2279_v38 }
 0xc5b   : > { %v2288_v41 = vsub.f32 0.0, %v2287_v40 }
 0xc5d   : > { %v2289_v43 = vmul.f32 1.442695, %v2288_v41 }
 0xc5f   : > { %2871 = vpow2.f32 %v2289_v43 }
 0xc69   : > { %v2872_v44 = vpop.eup %2871 }
 0xc6a   : > { %v2291_v12 = vadd.f32 1.0, %v2872_v44 }
 0xc6c   : > { %2873 = vrcp.f32 %v2291_v12 }
 0xc76   : > { %v2874_v45 = vpop.eup %2873 }
 0xc77   : > { %2295 = vst.msk [vmem:[%s3463_s30] sm:$0x3] %vm2294_vm11, %v2874_v45 }
 0xc78 PF: > { %s3464_s15 = sld [smem:[#allocation6_spill]]  ;;  %s3465_s29 = sld [smem:[#allocation5_spill]] }
 0xc79   : > { %s3466_s30 = sld [smem:[#allocation7_spill]] }
 0xc7e   : > { %s30_s0 = sadd.s32 1, %s3464_s15  }
 0xc7f   : > { %p27_p7 = scmp.ge.s32.totalorder %s30_s0, 4  }
 0xc81   :  { %29 = sbr.rel (!%p27_p7) target bundleno = 9 (0x9), region = 171 }

</bundles_post_ra>
